<compile_context>
chip_gen: v5e
topology: v5e:2x2
jax: 0.10.0
libtpu: 0.0.40
codegen_flags: <defaults>
</compile_context>

<pallas_src>
import math
import functools

import jax
import jax.numpy as jnp
from jax import lax
from jax.experimental import pallas as pl
from jax.experimental.pallas import tpu as pltpu


# ----------------------------------------------------------------------------
# Kernel: one (batch, row-tile) step computes q, k, v for that tile and writes
# them directly in (heads, tokens, D) layout.
# ----------------------------------------------------------------------------
def _sepconv_qkv_kernel(*refs, TL, W, K, C, heads, D, inner, self_attn,
                        fuse_pw, out_dtype):
    # refs (self_attn=True):  x_ref, wdw_ref, bdw_ref, wpw_ref, bpw_ref, q,k,v
    # refs (self_attn=False): x_ref, kv_ref, wdw_ref, bdw_ref, wpw_ref, bpw_ref, q,k,v
    #
    # x_ref / kv_ref : (Lp, Wp, C) zero-padded NHWC image, resident per batch
    # wdw_ref        : (3, K, K, C)  depthwise weights packed [q, k, v]
    # bdw_ref        : (3, C)        depthwise bias
    # wpw_ref        : fused -> (3C, 3*inner) block-diagonal, else (3, C, inner)
    # bpw_ref        : fused -> (1, 3*inner),                 else (3, inner)
    # q/k/v refs     : (heads, TL*W, D)
    if self_attn:
        x_ref, wdw_ref, bdw_ref, wpw_ref, bpw_ref, q_ref, k_ref, v_ref = refs
        kv_ref = None
    else:
        (x_ref, kv_ref, wdw_ref, bdw_ref, wpw_ref, bpw_ref,
         q_ref, k_ref, v_ref) = refs

    t = pl.program_id(1)
    TLp = TL + K - 1
    row0 = pl.multiple_of(t * TL, TL)

    # Halo'd row tile sliced straight out of the batch-resident padded image.
    # TODO(synk): for a bf16 model the fp32 upcast could be dropped on v6e/v7x.
    x_tile = x_ref[pl.ds(row0, TLp), :, :].astype(jnp.float32)   # (TLp, Wp, C)

    wdw = wdw_ref[...].astype(jnp.float32)                       # (3, K, K, C)
    bdw = bdw_ref[...].astype(jnp.float32)                       # (3, C)

    # Depthwise KxK as shifted VPU MACs.  The dj (sublane-shift) slabs are
    # hoisted out of the di loop so each shifted copy is built once per image;
    # the di shifts are outer-dim views (no relayout).
    x_cols = [x_tile[:, dj:dj + W, :] for dj in range(K)]
    if self_attn:
        kv_cols = x_cols
    else:
        kv_tile = kv_ref[pl.ds(row0, TLp), :, :].astype(jnp.float32)
        kv_cols = [kv_tile[:, dj:dj + W, :] for dj in range(K)]

    accs = [jnp.zeros((TL, W, C), jnp.float32) for _ in range(3)]
    for dj in range(K):
        xc, kc = x_cols[dj], kv_cols[dj]
        for di in range(K):
            xs = xc[di:di + TL]                       # q reads x
            ks = xs if self_attn else kc[di:di + TL]  # k, v read attn_kv
            accs[0] = accs[0] + xs * wdw[0, di, dj, :]
            accs[1] = accs[1] + ks * wdw[1, di, dj, :]
            accs[2] = accs[2] + ks * wdw[2, di, dj, :]

    # Bias + ReLU, flatten tokens (leading-dim merge only: no lane relayout).
    ys = [jnp.maximum(accs[p] + bdw[p, :], 0.0).reshape(TL * W, C)
          for p in range(3)]

    out_refs = (q_ref, k_ref, v_ref)
    if fuse_pw:
        # Single block-diagonal MXU pass: (tokens, 3C) @ (3C, 3*inner).
        y_cat = jnp.concatenate(ys, axis=-1)
        o = jnp.dot(y_cat, wpw_ref[...].astype(jnp.float32),
                    preferred_element_type=jnp.float32)          # (toks, 3*inner)
        o = o + bpw_ref[...].astype(jnp.float32)                 # (1, 3*inner)
        # Head permutation in the epilogue: slice (tokens, D) panels out of the
        # packed result and store directly into the (heads, tokens, D) blocks.
        # (D-last stores are forced by the module's (B, H, N, D) layout; a
        # fully lane-dense packed (B, N, 3*inner) output is available by
        # consuming `o` directly in a fused downstream kernel.)
        for p in range(3):
            for h in range(heads):
                col = p * inner + h * D
                out_refs[p][h, :, :] = o[:, col:col + D].astype(out_dtype)
    else:
        wpw = wpw_ref[...].astype(jnp.float32)                   # (3, C, inner)
        bpw = bpw_ref[...].astype(jnp.float32)                   # (3, inner)
        for p in range(3):
            o = jnp.dot(ys[p], wpw[p],
                        preferred_element_type=jnp.float32) + bpw[p]
            for h in range(heads):
                out_refs[p][h, :, :] = o[:, h * D:(h + 1) * D].astype(out_dtype)


# ----------------------------------------------------------------------------
# Tiling / VMEM heuristics (generation-aware)
# ----------------------------------------------------------------------------
def _vmem_budget():
    try:
        cap = pltpu.get_tpu_info().vmem_capacity_bytes
    except Exception:
        cap = 64 << 20                       # conservative (v7x per-TC VMEM)
    budget = max(cap // 4, 4 << 20)          # ~32 MiB v5e/v6e, ~16 MiB v7x
    limit = min((cap * 3) // 4, 96 << 20)    # ~96 MiB v5e/v6e, ~48 MiB v7x
    return budget, int(limit)


def _pick_tile_rows(L, W, C, inner, K, n_imgs, B, budget_bytes):
    """Largest divisor row-tile whose per-step VMEM stays under budget.

    Includes the batch-resident padded image(s), double-buffered weights
    (notably the pointwise block: 3C*3*inner) and fp32 intermediates.
    """
    pad = (K - 1) // 2
    Lp, Wp = L + 2 * pad, W + 2 * pad
    fixed = 4 * (n_imgs * 2 * Lp * Wp * C                       # resident imgs, 2 bufs
                 + 2 * (3 * K * K * C + 3 * C                   # depthwise w+b, 2 bufs
                        + 3 * C * 3 * inner + 3 * inner))       # pointwise w+b, 2 bufs

    def cost(tl):
        tlp = tl + 2 * pad
        toks = tl * W
        return fixed + 4 * (
            3 * 2 * toks * inner                 # double-buffered q/k/v out blocks
            + 4 * toks * inner                   # fp32 packed pointwise result (+slack)
            + (6 + K) * toks * C                 # accumulators + relu'd ys + concat
            + n_imgs * (K + 1) * tlp * Wp * C)   # fp32 tile + hoisted dj slabs

    cands = [d for d in range(1, L + 1)
             if L % d == 0 and ((d * W) % 8 == 0 or d == L)]
    ok = [d for d in cands if cost(d) <= budget_bytes]
    tl = max(ok) if ok else min(cands)
    if B == 1 and tl == L:
        # keep >= 2 grid steps so both v7x TensorCores get work
        halves = [d for d in (ok if ok else cands) if d <= L // 2]
        if halves:
            tl = max(halves)
    return tl


# ----------------------------------------------------------------------------
# Wrapper
# ----------------------------------------------------------------------------
def conv_projection_pallas(x, params, heads, attn_kv=None, kernel_size=3,
                           tile_rows=None, out_dtype=None):
    """x: (B, N, C). Returns (q, k, v), each (B, heads, N, dim_head), written
    directly by the kernel (no wrapper-side transpose).

    params:
      wdw: (3, K, K, C)    depthwise weights (torch (C,1,K,K) -> (K,K,C)) for q,k,v
      bdw: (3, C)          depthwise bias
      wpw: (3, C, inner)   pointwise weights (torch (inner,C,1,1) -> (C,inner))
      bpw: (3, inner)      pointwise bias
    """
    B, N, C = x.shape
    L = math.isqrt(N)
    W = L
    assert L * W == N, "N must be a perfect square"
    K = kernel_size
    pad = (K - 1) // 2
    inner = params["wpw"].shape[-1]
    assert inner % heads == 0
    D = inner // heads
    self_attn = attn_kv is None
    n_imgs = 1 if self_attn else 2
    if out_dtype is None:
        out_dtype = x.dtype          # pass jnp.bfloat16 to halve output HBM traffic

    budget, vmem_limit = _vmem_budget()
    if tile_rows is None:
        tile_rows = _pick_tile_rows(L, W, C, inner, K, n_imgs, B, budget)
    TL = tile_rows
    assert L % TL == 0, "tile_rows must divide the spatial height"
    NT = L // TL
    Lp, Wp = L + 2 * pad, W + 2 * pad

    def to_padded(t):
        # One cheap pad pass over the (small) input; the NT-way halo
        # duplication / stack pre-pass is gone -- each padded image is DMA'd
        # into VMEM once per batch and row tiles are sliced in-kernel.
        return jnp.pad(t.reshape(B, L, W, C),
                       ((0, 0), (pad, pad), (pad, pad), (0, 0)))

    imgs = [to_padded(x)]
    if not self_attn:
        imgs.append(to_padded(attn_kv))

    wdw = params["wdw"]                      # (3, K, K, C)
    bdw = params["bdw"].reshape(3, C)        # (3, C)

    fuse_pw = 3 * C <= 128                   # one MXU K pass even on v5e
    if fuse_pw:
        wpw_pass = jnp.zeros((3 * C, 3 * inner), params["wpw"].dtype)
        for p in range(3):
            wpw_pass = wpw_pass.at[p * C:(p + 1) * C,
                                   p * inner:(p + 1) * inner].set(params["wpw"][p])
        bpw_pass = params["bpw"].reshape(1, 3 * inner)
        wpw_spec = pl.BlockSpec((3 * C, 3 * inner), lambda b, t: (0, 0))
        bpw_spec = pl.BlockSpec((1, 3 * inner), lambda b, t: (0, 0))
    else:
        wpw_pass = params["wpw"]
        bpw_pass = params["bpw"].reshape(3, inner)
        wpw_spec = pl.BlockSpec((3, C, inner), lambda b, t: (0, 0, 0))
        bpw_spec = pl.BlockSpec((3, inner), lambda b, t: (0, 0))

    # Image block index is independent of t -> stays resident in VMEM across
    # the row-tile axis (no re-DMA per tile).
    img_spec = pl.BlockSpec((None, Lp, Wp, C), lambda b, t: (b, 0, 0, 0))
    in_specs = [img_spec] * n_imgs + [
        pl.BlockSpec((3, K, K, C), lambda b, t: (0, 0, 0, 0)),
        pl.BlockSpec((3, C), lambda b, t: (0, 0)),
        wpw_spec,
        bpw_spec,
    ]
    out_spec = pl.BlockSpec((None, heads, TL * W, D), lambda b, t: (b, 0, t, 0))
    out_sds = jax.ShapeDtypeStruct((B, heads, N, D), out_dtype)

    kernel = functools.partial(
        _sepconv_qkv_kernel, TL=TL, W=W, K=K, C=C, heads=heads, D=D,
        inner=inner, self_attn=self_attn, fuse_pw=fuse_pw, out_dtype=out_dtype)

    q, k, v = pl.pallas_call(
        kernel,
        out_shape=(out_sds, out_sds, out_sds),
        grid_spec=pltpu.PrefetchScalarGridSpec(
            num_scalar_prefetch=0,
            grid=(B, NT),                      # batch leading: shards across TCs
            in_specs=in_specs,
            out_specs=[out_spec, out_spec, out_spec],
        ),
        compiler_params=pltpu.CompilerParams(
            dimension_semantics=("parallel", "parallel"),
            vmem_limit_bytes=vmem_limit),
    )(*imgs, wdw, bdw, wpw_pass, bpw_pass)
    return q, k, v


# ----------------------------------------------------------------------------
# Pure-JAX reference (lax convs) for verification.
# ----------------------------------------------------------------------------
def conv_projection_ref(x, params, heads, attn_kv=None, kernel_size=3):
    B, N, C = x.shape
    L = math.isqrt(N)
    K = kernel_size
    pad = (K - 1) // 2
    inner = params["wpw"].shape[-1]
    D = inner // heads
    attn_kv = x if attn_kv is None else attn_kv

    def one_proj(t, p):
        img = t.reshape(B, L, L, C)                                   # NHWC
        wdw = params["wdw"][p].reshape(K, K, 1, C)                    # HWIO, groups=C
        y = lax.conv_general_dilated(
            img, wdw, window_strides=(1, 1), padding=[(pad, pad), (pad, pad)],
            dimension_numbers=("NHWC", "HWIO", "NHWC"),
            feature_group_count=C, precision=lax.Precision.HIGHEST)
        y = y + params["bdw"][p].reshape(C)
        y = jnp.maximum(y, 0.0)
        y = jnp.einsum("blwc,ci->blwi", y, params["wpw"][p],
                       precision=lax.Precision.HIGHEST) + params["bpw"][p].reshape(inner)
        return y.reshape(B, N, heads, D).transpose(0, 2, 1, 3)

    return one_proj(x, 0), one_proj(attn_kv, 1), one_proj(attn_kv, 2)


if __name__ == "__main__":
    def run_case(name, B, C, L, heads, dim_head, cross, tile_rows, key):
        N = L * L
        K = 3
        inner = heads * dim_head
        ks = jax.random.split(key, 6)
        x = jax.random.normal(ks[0], (B, N, C), dtype=jnp.float32)
        attn_kv = (jax.random.normal(ks[5], (B, N, C), dtype=jnp.float32)
                   if cross else None)
        params = {
            "wdw": 0.1 * jax.random.normal(ks[1], (3, K, K, C), dtype=jnp.float32),
            "bdw": 0.1 * jax.random.normal(ks[2], (3, C), dtype=jnp.float32),
            "wpw": 0.1 * jax.random.normal(ks[3], (3, C, inner), dtype=jnp.float32),
            "bpw": 0.1 * jax.random.normal(ks[4], (3, inner), dtype=jnp.float32),
        }

        q, k, v = conv_projection_pallas(x, params, heads, attn_kv=attn_kv,
                                         kernel_size=K, tile_rows=tile_rows)
        jax.block_until_ready((q, k, v))

        q_r, k_r, v_r = conv_projection_ref(x, params, heads, attn_kv=attn_kv,
                                            kernel_size=K)
        assert q.shape == (B, heads, N, dim_head)
        assert k.shape == (B, heads, N, dim_head)
        assert v.shape == (B, heads, N, dim_head)
        for got, ref in ((q, q_r), (k, k_r), (v, v_r)):
            assert jnp.allclose(got, ref, atol=2e-3, rtol=2e-3), \
                f"mismatch vs reference in case {name}"

    key = jax.random.PRNGKey(0)
    k1, k2, k3 = jax.random.split(key, 3)
    # Self-attention, tiny C, fused block-diagonal pointwise, single row tile.
    run_case("self_small", B=2, C=4, L=8, heads=2, dim_head=4,
             cross=False, tile_rows=None, key=k1)
    # Cross-attention, 2 row tiles, fused pointwise (3C=96 <= 128), inner=128.
    run_case("cross_tiled", B=2, C=32, L=8, heads=2, dim_head=64,
             cross=True, tile_rows=4, key=k2)
    # B=1 (forces NT>=2 for v7x dual-TC), 3C=144 > 128 -> unfused pointwise path.
    run_case("self_bigC_unfused", B=1, C=48, L=8, heads=2, dim_head=64,
             cross=False, tile_rows=None, key=k3)

    print("KERNEL_OK")
</pallas_src>

<mosaic_0001>
module attributes {stable_mosaic.version = 11 : i64} {
  func.func @_sepconv_qkv_kernel(%arg0: i32, %arg1: i32, %arg2: memref<1x10x10x4xf32, #tpu.memory_space<vmem>>, %arg3: memref<3x3x3x4xf32, #tpu.memory_space<vmem>>, %arg4: memref<3x4xf32, #tpu.memory_space<vmem>>, %arg5: memref<12x24xf32, #tpu.memory_space<vmem>>, %arg6: memref<1x24xf32, #tpu.memory_space<vmem>>, %arg7: memref<1x2x64x4xf32, #tpu.memory_space<vmem>>, %arg8: memref<1x2x64x4xf32, #tpu.memory_space<vmem>>, %arg9: memref<1x2x64x4xf32, #tpu.memory_space<vmem>>) attributes {dimension_semantics = [#tpu.dimension_semantics<parallel>, #tpu.dimension_semantics<parallel>], iteration_bounds = array<i64: 2, 1>, scalar_prefetch = 0 : i64, scratch_operands = 0 : i64, tpu.core_type = #tpu.core_type<tc>, window_params = [{transform_indices = @transform_0, window_bounds = array<i64: 1, 10, 10, 4>}, {pipeline_mode = #tpu.pipeline_mode<synchronous>, transform_indices = @transform_1, window_bounds = array<i64: 3, 3, 3, 4>}, {pipeline_mode = #tpu.pipeline_mode<synchronous>, transform_indices = @transform_2, window_bounds = array<i64: 3, 4>}, {pipeline_mode = #tpu.pipeline_mode<synchronous>, transform_indices = @transform_3, window_bounds = array<i64: 12, 24>}, {pipeline_mode = #tpu.pipeline_mode<synchronous>, transform_indices = @transform_4, window_bounds = array<i64: 1, 24>}, {transform_indices = @transform_5, window_bounds = array<i64: 1, 2, 64, 4>}, {transform_indices = @transform_6, window_bounds = array<i64: 1, 2, 64, 4>}, {transform_indices = @transform_7, window_bounds = array<i64: 1, 2, 64, 4>}]} {
    %c8_i32 = arith.constant 8 : i32
    %0 = arith.muli %arg1, %c8_i32 : i32
    %1 = tpu.assume_multiple %0, 8 : i32
    %c0 = arith.constant 0 : index
    %2 = arith.index_cast %1 : i32 to index
    %c0_0 = arith.constant 0 : index
    %c0_1 = arith.constant 0 : index
    %3 = vector.load %arg2[%c0, %2, %c0_0, %c0_1] : memref<1x10x10x4xf32, #tpu.memory_space<vmem>>, vector<1x10x10x4xf32>
    %4 = vector.shape_cast %3 : vector<1x10x10x4xf32> to vector<10x10x4xf32>
    %c0_2 = arith.constant 0 : index
    %c0_3 = arith.constant 0 : index
    %c0_4 = arith.constant 0 : index
    %c0_5 = arith.constant 0 : index
    %5 = vector.load %arg3[%c0_2, %c0_3, %c0_4, %c0_5] : memref<3x3x3x4xf32, #tpu.memory_space<vmem>>, vector<3x3x3x4xf32>
    %c0_6 = arith.constant 0 : index
    %c0_7 = arith.constant 0 : index
    %6 = vector.load %arg4[%c0_6, %c0_7] : memref<3x4xf32, #tpu.memory_space<vmem>>, vector<3x4xf32>
    %7 = vector.extract_strided_slice %4 {offsets = [0, 0, 0], sizes = [10, 8, 4], strides = [1, 1, 1]} : vector<10x10x4xf32> to vector<10x8x4xf32>
    %8 = vector.extract_strided_slice %4 {offsets = [0, 1, 0], sizes = [10, 8, 4], strides = [1, 1, 1]} : vector<10x10x4xf32> to vector<10x8x4xf32>
    %9 = vector.extract_strided_slice %4 {offsets = [0, 2, 0], sizes = [10, 8, 4], strides = [1, 1, 1]} : vector<10x10x4xf32> to vector<10x8x4xf32>
    %cst = arith.constant 0.000000e+00 : f32
    %10 = vector.broadcast %cst : f32 to vector<8x8x4xf32>
    %cst_8 = arith.constant 0.000000e+00 : f32
    %11 = vector.broadcast %cst_8 : f32 to vector<8x8x4xf32>
    %cst_9 = arith.constant 0.000000e+00 : f32
    %12 = vector.broadcast %cst_9 : f32 to vector<8x8x4xf32>
    %13 = vector.extract_strided_slice %7 {offsets = [0, 0, 0], sizes = [8, 8, 4], strides = [1, 1, 1]} : vector<10x8x4xf32> to vector<8x8x4xf32>
    %14 = vector.extract_strided_slice %5 {offsets = [0, 0, 0, 0], sizes = [1, 1, 1, 4], strides = [1, 1, 1, 1]} : vector<3x3x3x4xf32> to vector<1x1x1x4xf32>
    %15 = vector.shape_cast %14 : vector<1x1x1x4xf32> to vector<4xf32>
    %16 = vector.shape_cast %15 : vector<4xf32> to vector<1x1x4xf32>
    %17 = vector.broadcast %16 : vector<1x1x4xf32> to vector<8x8x4xf32>
    %18 = arith.mulf %13, %17 : vector<8x8x4xf32>
    %19 = arith.addf %10, %18 : vector<8x8x4xf32>
    %20 = vector.extract_strided_slice %5 {offsets = [1, 0, 0, 0], sizes = [1, 1, 1, 4], strides = [1, 1, 1, 1]} : vector<3x3x3x4xf32> to vector<1x1x1x4xf32>
    %21 = vector.shape_cast %20 : vector<1x1x1x4xf32> to vector<4xf32>
    %22 = vector.shape_cast %21 : vector<4xf32> to vector<1x1x4xf32>
    %23 = vector.broadcast %22 : vector<1x1x4xf32> to vector<8x8x4xf32>
    %24 = arith.mulf %13, %23 : vector<8x8x4xf32>
    %25 = arith.addf %11, %24 : vector<8x8x4xf32>
    %26 = vector.extract_strided_slice %5 {offsets = [2, 0, 0, 0], sizes = [1, 1, 1, 4], strides = [1, 1, 1, 1]} : vector<3x3x3x4xf32> to vector<1x1x1x4xf32>
    %27 = vector.shape_cast %26 : vector<1x1x1x4xf32> to vector<4xf32>
    %28 = vector.shape_cast %27 : vector<4xf32> to vector<1x1x4xf32>
    %29 = vector.broadcast %28 : vector<1x1x4xf32> to vector<8x8x4xf32>
    %30 = arith.mulf %13, %29 : vector<8x8x4xf32>
    %31 = arith.addf %12, %30 : vector<8x8x4xf32>
    %32 = vector.extract_strided_slice %7 {offsets = [1, 0, 0], sizes = [8, 8, 4], strides = [1, 1, 1]} : vector<10x8x4xf32> to vector<8x8x4xf32>
    %33 = vector.extract_strided_slice %5 {offsets = [0, 1, 0, 0], sizes = [1, 1, 1, 4], strides = [1, 1, 1, 1]} : vector<3x3x3x4xf32> to vector<1x1x1x4xf32>
    %34 = vector.shape_cast %33 : vector<1x1x1x4xf32> to vector<4xf32>
    %35 = vector.shape_cast %34 : vector<4xf32> to vector<1x1x4xf32>
    %36 = vector.broadcast %35 : vector<1x1x4xf32> to vector<8x8x4xf32>
    %37 = arith.mulf %32, %36 : vector<8x8x4xf32>
    %38 = arith.addf %19, %37 : vector<8x8x4xf32>
    %39 = vector.extract_strided_slice %5 {offsets = [1, 1, 0, 0], sizes = [1, 1, 1, 4], strides = [1, 1, 1, 1]} : vector<3x3x3x4xf32> to vector<1x1x1x4xf32>
    %40 = vector.shape_cast %39 : vector<1x1x1x4xf32> to vector<4xf32>
    %41 = vector.shape_cast %40 : vector<4xf32> to vector<1x1x4xf32>
    %42 = vector.broadcast %41 : vector<1x1x4xf32> to vector<8x8x4xf32>
    %43 = arith.mulf %32, %42 : vector<8x8x4xf32>
    %44 = arith.addf %25, %43 : vector<8x8x4xf32>
    %45 = vector.extract_strided_slice %5 {offsets = [2, 1, 0, 0], sizes = [1, 1, 1, 4], strides = [1, 1, 1, 1]} : vector<3x3x3x4xf32> to vector<1x1x1x4xf32>
    %46 = vector.shape_cast %45 : vector<1x1x1x4xf32> to vector<4xf32>
    %47 = vector.shape_cast %46 : vector<4xf32> to vector<1x1x4xf32>
    %48 = vector.broadcast %47 : vector<1x1x4xf32> to vector<8x8x4xf32>
    %49 = arith.mulf %32, %48 : vector<8x8x4xf32>
    %50 = arith.addf %31, %49 : vector<8x8x4xf32>
    %51 = vector.extract_strided_slice %7 {offsets = [2, 0, 0], sizes = [8, 8, 4], strides = [1, 1, 1]} : vector<10x8x4xf32> to vector<8x8x4xf32>
    %52 = vector.extract_strided_slice %5 {offsets = [0, 2, 0, 0], sizes = [1, 1, 1, 4], strides = [1, 1, 1, 1]} : vector<3x3x3x4xf32> to vector<1x1x1x4xf32>
    %53 = vector.shape_cast %52 : vector<1x1x1x4xf32> to vector<4xf32>
    %54 = vector.shape_cast %53 : vector<4xf32> to vector<1x1x4xf32>
    %55 = vector.broadcast %54 : vector<1x1x4xf32> to vector<8x8x4xf32>
    %56 = arith.mulf %51, %55 : vector<8x8x4xf32>
    %57 = arith.addf %38, %56 : vector<8x8x4xf32>
    %58 = vector.extract_strided_slice %5 {offsets = [1, 2, 0, 0], sizes = [1, 1, 1, 4], strides = [1, 1, 1, 1]} : vector<3x3x3x4xf32> to vector<1x1x1x4xf32>
    %59 = vector.shape_cast %58 : vector<1x1x1x4xf32> to vector<4xf32>
    %60 = vector.shape_cast %59 : vector<4xf32> to vector<1x1x4xf32>
    %61 = vector.broadcast %60 : vector<1x1x4xf32> to vector<8x8x4xf32>
    %62 = arith.mulf %51, %61 : vector<8x8x4xf32>
    %63 = arith.addf %44, %62 : vector<8x8x4xf32>
    %64 = vector.extract_strided_slice %5 {offsets = [2, 2, 0, 0], sizes = [1, 1, 1, 4], strides = [1, 1, 1, 1]} : vector<3x3x3x4xf32> to vector<1x1x1x4xf32>
    %65 = vector.shape_cast %64 : vector<1x1x1x4xf32> to vector<4xf32>
    %66 = vector.shape_cast %65 : vector<4xf32> to vector<1x1x4xf32>
    %67 = vector.broadcast %66 : vector<1x1x4xf32> to vector<8x8x4xf32>
    %68 = arith.mulf %51, %67 : vector<8x8x4xf32>
    %69 = arith.addf %50, %68 : vector<8x8x4xf32>
    %70 = vector.extract_strided_slice %8 {offsets = [0, 0, 0], sizes = [8, 8, 4], strides = [1, 1, 1]} : vector<10x8x4xf32> to vector<8x8x4xf32>
    %71 = vector.extract_strided_slice %5 {offsets = [0, 0, 1, 0], sizes = [1, 1, 1, 4], strides = [1, 1, 1, 1]} : vector<3x3x3x4xf32> to vector<1x1x1x4xf32>
    %72 = vector.shape_cast %71 : vector<1x1x1x4xf32> to vector<4xf32>
    %73 = vector.shape_cast %72 : vector<4xf32> to vector<1x1x4xf32>
    %74 = vector.broadcast %73 : vector<1x1x4xf32> to vector<8x8x4xf32>
    %75 = arith.mulf %70, %74 : vector<8x8x4xf32>
    %76 = arith.addf %57, %75 : vector<8x8x4xf32>
    %77 = vector.extract_strided_slice %5 {offsets = [1, 0, 1, 0], sizes = [1, 1, 1, 4], strides = [1, 1, 1, 1]} : vector<3x3x3x4xf32> to vector<1x1x1x4xf32>
    %78 = vector.shape_cast %77 : vector<1x1x1x4xf32> to vector<4xf32>
    %79 = vector.shape_cast %78 : vector<4xf32> to vector<1x1x4xf32>
    %80 = vector.broadcast %79 : vector<1x1x4xf32> to vector<8x8x4xf32>
    %81 = arith.mulf %70, %80 : vector<8x8x4xf32>
    %82 = arith.addf %63, %81 : vector<8x8x4xf32>
    %83 = vector.extract_strided_slice %5 {offsets = [2, 0, 1, 0], sizes = [1, 1, 1, 4], strides = [1, 1, 1, 1]} : vector<3x3x3x4xf32> to vector<1x1x1x4xf32>
    %84 = vector.shape_cast %83 : vector<1x1x1x4xf32> to vector<4xf32>
    %85 = vector.shape_cast %84 : vector<4xf32> to vector<1x1x4xf32>
    %86 = vector.broadcast %85 : vector<1x1x4xf32> to vector<8x8x4xf32>
    %87 = arith.mulf %70, %86 : vector<8x8x4xf32>
    %88 = arith.addf %69, %87 : vector<8x8x4xf32>
    %89 = vector.extract_strided_slice %8 {offsets = [1, 0, 0], sizes = [8, 8, 4], strides = [1, 1, 1]} : vector<10x8x4xf32> to vector<8x8x4xf32>
    %90 = vector.extract_strided_slice %5 {offsets = [0, 1, 1, 0], sizes = [1, 1, 1, 4], strides = [1, 1, 1, 1]} : vector<3x3x3x4xf32> to vector<1x1x1x4xf32>
    %91 = vector.shape_cast %90 : vector<1x1x1x4xf32> to vector<4xf32>
    %92 = vector.shape_cast %91 : vector<4xf32> to vector<1x1x4xf32>
    %93 = vector.broadcast %92 : vector<1x1x4xf32> to vector<8x8x4xf32>
    %94 = arith.mulf %89, %93 : vector<8x8x4xf32>
    %95 = arith.addf %76, %94 : vector<8x8x4xf32>
    %96 = vector.extract_strided_slice %5 {offsets = [1, 1, 1, 0], sizes = [1, 1, 1, 4], strides = [1, 1, 1, 1]} : vector<3x3x3x4xf32> to vector<1x1x1x4xf32>
    %97 = vector.shape_cast %96 : vector<1x1x1x4xf32> to vector<4xf32>
    %98 = vector.shape_cast %97 : vector<4xf32> to vector<1x1x4xf32>
    %99 = vector.broadcast %98 : vector<1x1x4xf32> to vector<8x8x4xf32>
    %100 = arith.mulf %89, %99 : vector<8x8x4xf32>
    %101 = arith.addf %82, %100 : vector<8x8x4xf32>
    %102 = vector.extract_strided_slice %5 {offsets = [2, 1, 1, 0], sizes = [1, 1, 1, 4], strides = [1, 1, 1, 1]} : vector<3x3x3x4xf32> to vector<1x1x1x4xf32>
    %103 = vector.shape_cast %102 : vector<1x1x1x4xf32> to vector<4xf32>
    %104 = vector.shape_cast %103 : vector<4xf32> to vector<1x1x4xf32>
    %105 = vector.broadcast %104 : vector<1x1x4xf32> to vector<8x8x4xf32>
    %106 = arith.mulf %89, %105 : vector<8x8x4xf32>
    %107 = arith.addf %88, %106 : vector<8x8x4xf32>
    %108 = vector.extract_strided_slice %8 {offsets = [2, 0, 0], sizes = [8, 8, 4], strides = [1, 1, 1]} : vector<10x8x4xf32> to vector<8x8x4xf32>
    %109 = vector.extract_strided_slice %5 {offsets = [0, 2, 1, 0], sizes = [1, 1, 1, 4], strides = [1, 1, 1, 1]} : vector<3x3x3x4xf32> to vector<1x1x1x4xf32>
    %110 = vector.shape_cast %109 : vector<1x1x1x4xf32> to vector<4xf32>
    %111 = vector.shape_cast %110 : vector<4xf32> to vector<1x1x4xf32>
    %112 = vector.broadcast %111 : vector<1x1x4xf32> to vector<8x8x4xf32>
    %113 = arith.mulf %108, %112 : vector<8x8x4xf32>
    %114 = arith.addf %95, %113 : vector<8x8x4xf32>
    %115 = vector.extract_strided_slice %5 {offsets = [1, 2, 1, 0], sizes = [1, 1, 1, 4], strides = [1, 1, 1, 1]} : vector<3x3x3x4xf32> to vector<1x1x1x4xf32>
    %116 = vector.shape_cast %115 : vector<1x1x1x4xf32> to vector<4xf32>
    %117 = vector.shape_cast %116 : vector<4xf32> to vector<1x1x4xf32>
    %118 = vector.broadcast %117 : vector<1x1x4xf32> to vector<8x8x4xf32>
    %119 = arith.mulf %108, %118 : vector<8x8x4xf32>
    %120 = arith.addf %101, %119 : vector<8x8x4xf32>
    %121 = vector.extract_strided_slice %5 {offsets = [2, 2, 1, 0], sizes = [1, 1, 1, 4], strides = [1, 1, 1, 1]} : vector<3x3x3x4xf32> to vector<1x1x1x4xf32>
    %122 = vector.shape_cast %121 : vector<1x1x1x4xf32> to vector<4xf32>
    %123 = vector.shape_cast %122 : vector<4xf32> to vector<1x1x4xf32>
    %124 = vector.broadcast %123 : vector<1x1x4xf32> to vector<8x8x4xf32>
    %125 = arith.mulf %108, %124 : vector<8x8x4xf32>
    %126 = arith.addf %107, %125 : vector<8x8x4xf32>
    %127 = vector.extract_strided_slice %9 {offsets = [0, 0, 0], sizes = [8, 8, 4], strides = [1, 1, 1]} : vector<10x8x4xf32> to vector<8x8x4xf32>
    %128 = vector.extract_strided_slice %5 {offsets = [0, 0, 2, 0], sizes = [1, 1, 1, 4], strides = [1, 1, 1, 1]} : vector<3x3x3x4xf32> to vector<1x1x1x4xf32>
    %129 = vector.shape_cast %128 : vector<1x1x1x4xf32> to vector<4xf32>
    %130 = vector.shape_cast %129 : vector<4xf32> to vector<1x1x4xf32>
    %131 = vector.broadcast %130 : vector<1x1x4xf32> to vector<8x8x4xf32>
    %132 = arith.mulf %127, %131 : vector<8x8x4xf32>
    %133 = arith.addf %114, %132 : vector<8x8x4xf32>
    %134 = vector.extract_strided_slice %5 {offsets = [1, 0, 2, 0], sizes = [1, 1, 1, 4], strides = [1, 1, 1, 1]} : vector<3x3x3x4xf32> to vector<1x1x1x4xf32>
    %135 = vector.shape_cast %134 : vector<1x1x1x4xf32> to vector<4xf32>
    %136 = vector.shape_cast %135 : vector<4xf32> to vector<1x1x4xf32>
    %137 = vector.broadcast %136 : vector<1x1x4xf32> to vector<8x8x4xf32>
    %138 = arith.mulf %127, %137 : vector<8x8x4xf32>
    %139 = arith.addf %120, %138 : vector<8x8x4xf32>
    %140 = vector.extract_strided_slice %5 {offsets = [2, 0, 2, 0], sizes = [1, 1, 1, 4], strides = [1, 1, 1, 1]} : vector<3x3x3x4xf32> to vector<1x1x1x4xf32>
    %141 = vector.shape_cast %140 : vector<1x1x1x4xf32> to vector<4xf32>
    %142 = vector.shape_cast %141 : vector<4xf32> to vector<1x1x4xf32>
    %143 = vector.broadcast %142 : vector<1x1x4xf32> to vector<8x8x4xf32>
    %144 = arith.mulf %127, %143 : vector<8x8x4xf32>
    %145 = arith.addf %126, %144 : vector<8x8x4xf32>
    %146 = vector.extract_strided_slice %9 {offsets = [1, 0, 0], sizes = [8, 8, 4], strides = [1, 1, 1]} : vector<10x8x4xf32> to vector<8x8x4xf32>
    %147 = vector.extract_strided_slice %5 {offsets = [0, 1, 2, 0], sizes = [1, 1, 1, 4], strides = [1, 1, 1, 1]} : vector<3x3x3x4xf32> to vector<1x1x1x4xf32>
    %148 = vector.shape_cast %147 : vector<1x1x1x4xf32> to vector<4xf32>
    %149 = vector.shape_cast %148 : vector<4xf32> to vector<1x1x4xf32>
    %150 = vector.broadcast %149 : vector<1x1x4xf32> to vector<8x8x4xf32>
    %151 = arith.mulf %146, %150 : vector<8x8x4xf32>
    %152 = arith.addf %133, %151 : vector<8x8x4xf32>
    %153 = vector.extract_strided_slice %5 {offsets = [1, 1, 2, 0], sizes = [1, 1, 1, 4], strides = [1, 1, 1, 1]} : vector<3x3x3x4xf32> to vector<1x1x1x4xf32>
    %154 = vector.shape_cast %153 : vector<1x1x1x4xf32> to vector<4xf32>
    %155 = vector.shape_cast %154 : vector<4xf32> to vector<1x1x4xf32>
    %156 = vector.broadcast %155 : vector<1x1x4xf32> to vector<8x8x4xf32>
    %157 = arith.mulf %146, %156 : vector<8x8x4xf32>
    %158 = arith.addf %139, %157 : vector<8x8x4xf32>
    %159 = vector.extract_strided_slice %5 {offsets = [2, 1, 2, 0], sizes = [1, 1, 1, 4], strides = [1, 1, 1, 1]} : vector<3x3x3x4xf32> to vector<1x1x1x4xf32>
    %160 = vector.shape_cast %159 : vector<1x1x1x4xf32> to vector<4xf32>
    %161 = vector.shape_cast %160 : vector<4xf32> to vector<1x1x4xf32>
    %162 = vector.broadcast %161 : vector<1x1x4xf32> to vector<8x8x4xf32>
    %163 = arith.mulf %146, %162 : vector<8x8x4xf32>
    %164 = arith.addf %145, %163 : vector<8x8x4xf32>
    %165 = vector.extract_strided_slice %9 {offsets = [2, 0, 0], sizes = [8, 8, 4], strides = [1, 1, 1]} : vector<10x8x4xf32> to vector<8x8x4xf32>
    %166 = vector.extract_strided_slice %5 {offsets = [0, 2, 2, 0], sizes = [1, 1, 1, 4], strides = [1, 1, 1, 1]} : vector<3x3x3x4xf32> to vector<1x1x1x4xf32>
    %167 = vector.shape_cast %166 : vector<1x1x1x4xf32> to vector<4xf32>
    %168 = vector.shape_cast %167 : vector<4xf32> to vector<1x1x4xf32>
    %169 = vector.broadcast %168 : vector<1x1x4xf32> to vector<8x8x4xf32>
    %170 = arith.mulf %165, %169 : vector<8x8x4xf32>
    %171 = arith.addf %152, %170 : vector<8x8x4xf32>
    %172 = vector.extract_strided_slice %5 {offsets = [1, 2, 2, 0], sizes = [1, 1, 1, 4], strides = [1, 1, 1, 1]} : vector<3x3x3x4xf32> to vector<1x1x1x4xf32>
    %173 = vector.shape_cast %172 : vector<1x1x1x4xf32> to vector<4xf32>
    %174 = vector.shape_cast %173 : vector<4xf32> to vector<1x1x4xf32>
    %175 = vector.broadcast %174 : vector<1x1x4xf32> to vector<8x8x4xf32>
    %176 = arith.mulf %165, %175 : vector<8x8x4xf32>
    %177 = arith.addf %158, %176 : vector<8x8x4xf32>
    %178 = vector.extract_strided_slice %5 {offsets = [2, 2, 2, 0], sizes = [1, 1, 1, 4], strides = [1, 1, 1, 1]} : vector<3x3x3x4xf32> to vector<1x1x1x4xf32>
    %179 = vector.shape_cast %178 : vector<1x1x1x4xf32> to vector<4xf32>
    %180 = vector.shape_cast %179 : vector<4xf32> to vector<1x1x4xf32>
    %181 = vector.broadcast %180 : vector<1x1x4xf32> to vector<8x8x4xf32>
    %182 = arith.mulf %165, %181 : vector<8x8x4xf32>
    %183 = arith.addf %164, %182 : vector<8x8x4xf32>
    %184 = vector.extract_strided_slice %6 {offsets = [0, 0], sizes = [1, 4], strides = [1, 1]} : vector<3x4xf32> to vector<1x4xf32>
    %185 = vector.shape_cast %184 : vector<1x4xf32> to vector<4xf32>
    %186 = vector.shape_cast %185 : vector<4xf32> to vector<1x1x4xf32>
    %187 = vector.broadcast %186 : vector<1x1x4xf32> to vector<8x8x4xf32>
    %188 = arith.addf %171, %187 : vector<8x8x4xf32>
    %cst_10 = arith.constant 0.000000e+00 : f32
    %189 = vector.broadcast %cst_10 : f32 to vector<8x8x4xf32>
    %190 = arith.maximumf %188, %189 : vector<8x8x4xf32>
    %191 = vector.shape_cast %190 : vector<8x8x4xf32> to vector<64x4xf32>
    %192 = vector.extract_strided_slice %6 {offsets = [1, 0], sizes = [1, 4], strides = [1, 1]} : vector<3x4xf32> to vector<1x4xf32>
    %193 = vector.shape_cast %192 : vector<1x4xf32> to vector<4xf32>
    %194 = vector.shape_cast %193 : vector<4xf32> to vector<1x1x4xf32>
    %195 = vector.broadcast %194 : vector<1x1x4xf32> to vector<8x8x4xf32>
    %196 = arith.addf %177, %195 : vector<8x8x4xf32>
    %cst_11 = arith.constant 0.000000e+00 : f32
    %197 = vector.broadcast %cst_11 : f32 to vector<8x8x4xf32>
    %198 = arith.maximumf %196, %197 : vector<8x8x4xf32>
    %199 = vector.shape_cast %198 : vector<8x8x4xf32> to vector<64x4xf32>
    %200 = vector.extract_strided_slice %6 {offsets = [2, 0], sizes = [1, 4], strides = [1, 1]} : vector<3x4xf32> to vector<1x4xf32>
    %201 = vector.shape_cast %200 : vector<1x4xf32> to vector<4xf32>
    %202 = vector.shape_cast %201 : vector<4xf32> to vector<1x1x4xf32>
    %203 = vector.broadcast %202 : vector<1x1x4xf32> to vector<8x8x4xf32>
    %204 = arith.addf %183, %203 : vector<8x8x4xf32>
    %cst_12 = arith.constant 0.000000e+00 : f32
    %205 = vector.broadcast %cst_12 : f32 to vector<8x8x4xf32>
    %206 = arith.maximumf %204, %205 : vector<8x8x4xf32>
    %207 = vector.shape_cast %206 : vector<8x8x4xf32> to vector<64x4xf32>
    %208 = tpu.concatenate %191, %199, %207 in 1 : vector<64x4xf32>, vector<64x4xf32>, vector<64x4xf32> -> vector<64x12xf32>
    %c0_13 = arith.constant 0 : index
    %c0_14 = arith.constant 0 : index
    %209 = vector.load %arg5[%c0_13, %c0_14] : memref<12x24xf32, #tpu.memory_space<vmem>>, vector<12x24xf32>
    %cst_15 = arith.constant dense<0.000000e+00> : vector<64x24xf32>
    %210 = tpu.matmul %208, %209, %cst_15 {dimension_numbers = #tpu.dot_dimension_numbers<[1], [0], [0], [1], [0, 0, 1, 1], [], []>} : vector<64x12xf32>, vector<12x24xf32>, vector<64x24xf32> -> vector<64x24xf32>
    %c0_16 = arith.constant 0 : index
    %c0_17 = arith.constant 0 : index
    %211 = vector.load %arg6[%c0_16, %c0_17] : memref<1x24xf32, #tpu.memory_space<vmem>>, vector<1x24xf32>
    %212 = vector.broadcast %211 : vector<1x24xf32> to vector<64x24xf32>
    %213 = arith.addf %210, %212 : vector<64x24xf32>
    %214 = vector.extract_strided_slice %213 {offsets = [0, 0], sizes = [64, 4], strides = [1, 1]} : vector<64x24xf32> to vector<64x4xf32>
    %c0_18 = arith.constant 0 : index
    %c0_19 = arith.constant 0 : index
    %c0_20 = arith.constant 0 : index
    %c0_21 = arith.constant 0 : index
    %215 = vector.load %arg7[%c0_18, %c0_19, %c0_20, %c0_21] : memref<1x2x64x4xf32, #tpu.memory_space<vmem>>, vector<1x1x64x4xf32>
    %216 = vector.shape_cast %215 : vector<1x1x64x4xf32> to vector<64x4xf32>
    %217 = vector.shape_cast %214 : vector<64x4xf32> to vector<1x1x64x4xf32>
    tpu.vector_store %arg7[%c0_18, %c0_19, %c0_20, %c0_21], %217 {strides = array<i32>} : memref<1x2x64x4xf32, #tpu.memory_space<vmem>>, vector<1x1x64x4xf32>,
    %218 = vector.extract_strided_slice %213 {offsets = [0, 4], sizes = [64, 4], strides = [1, 1]} : vector<64x24xf32> to vector<64x4xf32>
    %c0_22 = arith.constant 0 : index
    %c1 = arith.constant 1 : index
    %c0_23 = arith.constant 0 : index
    %c0_24 = arith.constant 0 : index
    %219 = vector.load %arg7[%c0_22, %c1, %c0_23, %c0_24] : memref<1x2x64x4xf32, #tpu.memory_space<vmem>>, vector<1x1x64x4xf32>
    %220 = vector.shape_cast %219 : vector<1x1x64x4xf32> to vector<64x4xf32>
    %221 = vector.shape_cast %218 : vector<64x4xf32> to vector<1x1x64x4xf32>
    tpu.vector_store %arg7[%c0_22, %c1, %c0_23, %c0_24], %221 {strides = array<i32>} : memref<1x2x64x4xf32, #tpu.memory_space<vmem>>, vector<1x1x64x4xf32>,
    %222 = vector.extract_strided_slice %213 {offsets = [0, 8], sizes = [64, 4], strides = [1, 1]} : vector<64x24xf32> to vector<64x4xf32>
    %c0_25 = arith.constant 0 : index
    %c0_26 = arith.constant 0 : index
    %c0_27 = arith.constant 0 : index
    %c0_28 = arith.constant 0 : index
    %223 = vector.load %arg8[%c0_25, %c0_26, %c0_27, %c0_28] : memref<1x2x64x4xf32, #tpu.memory_space<vmem>>, vector<1x1x64x4xf32>
    %224 = vector.shape_cast %223 : vector<1x1x64x4xf32> to vector<64x4xf32>
    %225 = vector.shape_cast %222 : vector<64x4xf32> to vector<1x1x64x4xf32>
    tpu.vector_store %arg8[%c0_25, %c0_26, %c0_27, %c0_28], %225 {strides = array<i32>} : memref<1x2x64x4xf32, #tpu.memory_space<vmem>>, vector<1x1x64x4xf32>,
    %226 = vector.extract_strided_slice %213 {offsets = [0, 12], sizes = [64, 4], strides = [1, 1]} : vector<64x24xf32> to vector<64x4xf32>
    %c0_29 = arith.constant 0 : index
    %c1_30 = arith.constant 1 : index
    %c0_31 = arith.constant 0 : index
    %c0_32 = arith.constant 0 : index
    %227 = vector.load %arg8[%c0_29, %c1_30, %c0_31, %c0_32] : memref<1x2x64x4xf32, #tpu.memory_space<vmem>>, vector<1x1x64x4xf32>
    %228 = vector.shape_cast %227 : vector<1x1x64x4xf32> to vector<64x4xf32>
    %229 = vector.shape_cast %226 : vector<64x4xf32> to vector<1x1x64x4xf32>
    tpu.vector_store %arg8[%c0_29, %c1_30, %c0_31, %c0_32], %229 {strides = array<i32>} : memref<1x2x64x4xf32, #tpu.memory_space<vmem>>, vector<1x1x64x4xf32>,
    %230 = vector.extract_strided_slice %213 {offsets = [0, 16], sizes = [64, 4], strides = [1, 1]} : vector<64x24xf32> to vector<64x4xf32>
    %c0_33 = arith.constant 0 : index
    %c0_34 = arith.constant 0 : index
    %c0_35 = arith.constant 0 : index
    %c0_36 = arith.constant 0 : index
    %231 = vector.load %arg9[%c0_33, %c0_34, %c0_35, %c0_36] : memref<1x2x64x4xf32, #tpu.memory_space<vmem>>, vector<1x1x64x4xf32>
    %232 = vector.shape_cast %231 : vector<1x1x64x4xf32> to vector<64x4xf32>
    %233 = vector.shape_cast %230 : vector<64x4xf32> to vector<1x1x64x4xf32>
    tpu.vector_store %arg9[%c0_33, %c0_34, %c0_35, %c0_36], %233 {strides = array<i32>} : memref<1x2x64x4xf32, #tpu.memory_space<vmem>>, vector<1x1x64x4xf32>,
    %234 = vector.extract_strided_slice %213 {offsets = [0, 20], sizes = [64, 4], strides = [1, 1]} : vector<64x24xf32> to vector<64x4xf32>
    %c0_37 = arith.constant 0 : index
    %c1_38 = arith.constant 1 : index
    %c0_39 = arith.constant 0 : index
    %c0_40 = arith.constant 0 : index
    %235 = vector.load %arg9[%c0_37, %c1_38, %c0_39, %c0_40] : memref<1x2x64x4xf32, #tpu.memory_space<vmem>>, vector<1x1x64x4xf32>
    %236 = vector.shape_cast %235 : vector<1x1x64x4xf32> to vector<64x4xf32>
    %237 = vector.shape_cast %234 : vector<64x4xf32> to vector<1x1x64x4xf32>
    tpu.vector_store %arg9[%c0_37, %c1_38, %c0_39, %c0_40], %237 {strides = array<i32>} : memref<1x2x64x4xf32, #tpu.memory_space<vmem>>, vector<1x1x64x4xf32>,
    return
  }
  func.func @transform_0(%arg0: i32, %arg1: i32) -> (i32, i32, i32, i32) {
    %c0_i32 = arith.constant 0 : i32
    %c0_i32_0 = arith.constant 0 : i32
    %c0_i32_1 = arith.constant 0 : i32
    %c0_i32_2 = arith.constant 0 : i32
    return %arg0, %c0_i32, %c0_i32_0, %c0_i32_1 : i32, i32, i32, i32
  }
  func.func @transform_1(%arg0: i32, %arg1: i32) -> (i32, i32, i32, i32) {
    %c0_i32 = arith.constant 0 : i32
    %c0_i32_0 = arith.constant 0 : i32
    %c0_i32_1 = arith.constant 0 : i32
    %c0_i32_2 = arith.constant 0 : i32
    %c0_i32_3 = arith.constant 0 : i32
    return %c0_i32, %c0_i32_0, %c0_i32_1, %c0_i32_2 : i32, i32, i32, i32
  }
  func.func @transform_2(%arg0: i32, %arg1: i32) -> (i32, i32) {
    %c0_i32 = arith.constant 0 : i32
    %c0_i32_0 = arith.constant 0 : i32
    %c0_i32_1 = arith.constant 0 : i32
    return %c0_i32, %c0_i32_0 : i32, i32
  }
  func.func @transform_3(%arg0: i32, %arg1: i32) -> (i32, i32) {
    %c0_i32 = arith.constant 0 : i32
    %c0_i32_0 = arith.constant 0 : i32
    %c0_i32_1 = arith.constant 0 : i32
    return %c0_i32, %c0_i32_0 : i32, i32
  }
  func.func @transform_4(%arg0: i32, %arg1: i32) -> (i32, i32) {
    %c0_i32 = arith.constant 0 : i32
    %c0_i32_0 = arith.constant 0 : i32
    %c0_i32_1 = arith.constant 0 : i32
    return %c0_i32, %c0_i32_0 : i32, i32
  }
  func.func @transform_5(%arg0: i32, %arg1: i32) -> (i32, i32, i32, i32) {
    %c0_i32 = arith.constant 0 : i32
    %c0_i32_0 = arith.constant 0 : i32
    %c0_i32_1 = arith.constant 0 : i32
    return %arg0, %c0_i32, %arg1, %c0_i32_0 : i32, i32, i32, i32
  }
  func.func @transform_6(%arg0: i32, %arg1: i32) -> (i32, i32, i32, i32) {
    %c0_i32 = arith.constant 0 : i32
    %c0_i32_0 = arith.constant 0 : i32
    %c0_i32_1 = arith.constant 0 : i32
    return %arg0, %c0_i32, %arg1, %c0_i32_0 : i32, i32, i32, i32
  }
  func.func @transform_7(%arg0: i32, %arg1: i32) -> (i32, i32, i32, i32) {
    %c0_i32 = arith.constant 0 : i32
    %c0_i32_0 = arith.constant 0 : i32
    %c0_i32_1 = arith.constant 0 : i32
    return %arg0, %c0_i32, %arg1, %c0_i32_0 : i32, i32, i32, i32
  }
}

</mosaic_0001>

<bundles_post_ra>
// kernel: tpu_custom_call.1
= control target key start
LH: loop header
LB: loop body
LE: loop exit
PB: predicated region body
PF: predicated region fallthrough
CT: control target
= control target key end

     0   :  { %s2607_s24 = smov 0   ;;  %s2609_s25 = smov 0   ;;  %s3934_s0 = inlined_call_operand.vmem [shape: f32[2,10,10,4], index: 0, kind: input, shape index: {}]   ;;  %s3935_s1 = inlined_call_operand.vmem [shape: f32[3,3,3,4], index: 1, kind: input, shape index: {}]   ;;  %s3936_s2 = inlined_call_operand.vmem [shape: f32[3,4], index: 2, kind: input, shape index: {}]   ;;  %s3937_s3 = inlined_call_operand.vmem [shape: f32[12,24], index: 3, kind: input, shape index: {}]   ;;  %s3938_s4 = inlined_call_operand.vmem [shape: f32[1,24], index: 4, kind: input, shape index: {}]   ;;  %s3939_s5 = inlined_call_operand.vmem [shape: f32[2,2,64,4], index: 5, kind: output, shape index: {0}]   ;;  %s3940_s6 = inlined_call_operand.vmem [shape: f32[2,2,64,4], index: 6, kind: output, shape index: {1}]   ;;  %s3941_s7 = inlined_call_operand.vmem [shape: f32[2,2,64,4], index: 7, kind: output, shape index: {2}]  }
   0x1   :  { %s2611_s26 = smov 0  }
   0x2 LB: > { %s30_s27 = sadd.s32 1, %s2554_s25  ;;  %p2426_p0 = scmp.ge.s32.totalorder %s2558_s26, 1  ;;  %s2558_s26 = sphi %s2611_s26, %s18_s26   ;;  %s2554_s25 = sphi %s2609_s25, %s3943_s25   ;;  %s2550_s24 = sphi %s2607_s24, %s3942_s24  }
   0x3   : > { %p32_p1 = scmp.ge.s32.totalorder %s30_s27, 2  ;;  %p260_p2 = scmp.lt.s32.totalorder %s2558_s26, 3 }
   0x5   : > { %s3945_s27 = smov (%p32_p1, %s30_s27), 0  ;;  %p261_p3 = pnand %p2426_p0, %p260_p2 }
   0x6   : > { %p314_p4 = scmp.lt.s32.totalorder (!%p261_p3), %s2550_s24, 1  ;;  %s2560_s23 = smov (!%p261_p3), 8  }
   0x7   : > { %264 = sbr.rel (%p261_p3) target bundleno = 590 (0x24e), region = 40  ;;  %s2561_s28 = smov (!%p261_p3), 4  }
   0x8   : > { %s2564_s29 = smov (!%p261_p3), 116   ;;  %s2565_s30 = smov (!%p261_p3), 112  }
   0x9   : > { %s2566_s8 = smov (!%p261_p3), 108  }
   0xc   : > { %v378_v0 = vld [vmem:[%s3935_s1 + $0x18] sm:$0x7]  ;;  %v379_v1 = vld [vmem:[%s3935_s1 + $0x1c] sm:$0x7]  ;;  %v380_v2 = vld [vmem:[%s3935_s1 + $0x20] sm:$0x7] }
   0xd   : > { %v381_v3 = vld [vmem:[%s3936_s2] sm:$0x7]  ;;  %vm568_vm0 = vcmask 1046528   ;;  %s3947_s24 = smov (!%p314_p4, %s2550_s24), 1  ;;  %v2639_v4 = vperm.slane %v378_v0, 0  ;;  %v2641_v5 = vperm.slane %v379_v1, 0 }
   0xe   : > { %v2643_v6 = vperm.slane %v380_v2, 0  ;;  %v2645_v7 = vperm.slane %v378_v0, 1  ;;  %v2647_v8 = vperm.slane %v379_v1, 1  ;;  %v2649_v9 = vperm.slane %v380_v2, 1  ;;  %s2478_s13 = smul.u32 160, %s3947_s24  ;;  %s3766_s18 = sshll.u32 %s3947_s24, 7 }
   0xf   : > { %v2651_v10 = vperm.slane %v378_v0, 2  ;;  %v2653_v11 = vperm.slane %v379_v1, 2  ;;  %v2656_v12 = vperm.slane %v380_v2, 2  ;;  %v2658_v13 = vperm.slane %v381_v3, 2  ;;  %v375_v14 = vld [vmem:[%s3935_s1 + $0xc] sm:$0x7]  ;;  %s3833_s11 = scalar_lea.vmem %s3940_s6, %s3766_s18  ;;  %s3849_s14 = scalar_lea.vmem %s3941_s7, %s3766_s18 }
  0x10   : > { %v2663_v15 = vperm.slane %v381_v3, 1  ;;  %vm1226_vm1 = vcmask 1045504   ;;  %v376_v16 = vld [vmem:[%s3935_s1 + $0x10] sm:$0x7]  ;;  %v2671_v17 = vld [vmem:[%s3935_s1 + $0x14] sm:$0x7]  ;;  %s2680_s22 = scalar_lea.vmem %s3934_s0, %s2478_s13 }
  0x11   : > { %v2673_v18 = vperm.slane %v375_v14, 0  ;;  %v2675_v19 = vperm.slane %v375_v14, 1  ;;  %v2682_v20 = vperm.slane %v376_v16, 0  ;;  %v2685_v21 = vperm.slane %v2671_v17, 0  ;;  %v2693_v24 = vld [vmem:[%s2680_s22 + $0x40] sm:$0xff]  ;;  %v2699_v26 = vld [vmem:[%s2680_s22 + $0x50] sm:$0xff] }
  0x12   : > { %v2687_v22 = vperm.slane %v376_v16, 1  ;;  %v2690_v23 = vperm.slane %v2671_v17, 1  ;;  %v2696_v25 = vld [vmem:[%s2680_s22 + $0x48] sm:$0x3]  ;;  %v2701_v27 = vperm.slane %v375_v14, 2  ;;  %v2703_v28 = vperm.slane %v376_v16, 2 }
  0x13   : > { %v2706_v29 = vld [vmem:[%s2680_s22 + $0x58] sm:$0x3]  ;;  %v2709_v30 = vld [vmem:[%s2680_s22 + $0x60] sm:$0xff]  ;;  %v2712_v31 = vld [vmem:[%s2680_s22 + $0x68] sm:$0x3]  ;;  %v421_v32 = vmul.f32 %v2639_v4, %v2693_v24  ;;  %v472_v33 = vmul.f32 %v2641_v5, %v2699_v26  ;;  %v691_v34 = vmul.f32 %v2645_v7, %v2693_v24  ;;  %v692_v35 = vmul.f32 %v2645_v7, %v2696_v25  ;;  %s2562_s24 = smov 124  }
  0x14   : > { %v523_v36 = vmul.f32 %v2643_v6, %v2709_v30  ;;  %v910_v37 = vmul.f32 %v2647_v8, %v2699_v26  ;;  %v911_v38 = vmul.f32 %v2647_v8, %v2706_v29  ;;  %v1129_v39 = vmul.f32 %v2649_v9, %v2709_v30 }
  0x15   : > { %v480_v40 = vadd.f32 %v472_v33, %v421_v32  ;;  %v727_v41 = vrot.slane %v691_v34, 1  ;;  %v728_v42 = vrot.slane %v692_v35, 1  ;;  %v1130_v43 = vmul.f32 %v2649_v9, %v2712_v31 }
  0x16   : > { %v946_v44 = vrot.slane %v910_v37, 1  ;;  %v947_v45 = vrot.slane %v911_v38, 1  ;;  %v1165_v46 = vrot.slane %v1129_v39, 1  ;;  %v1349_v47 = vmul.f32 %v2651_v10, %v2693_v24 }
  0x17   : > { %v531_v48 = vadd.f32 %v523_v36, %v480_v40  ;;  %v729_v49 = vsel %vm568_vm0, %v727_v41, %v728_v42  ;;  %v1166_v50 = vrot.slane %v1130_v43, 1  ;;  %v1350_v51 = vmul.f32 %v2651_v10, %v2696_v25 }
  0x18   : > { %v948_v52 = vsel %vm568_vm0, %v946_v44, %v947_v45  ;;  %v1385_v53 = vrot.slane %v1349_v47, 2  ;;  %v1568_v54 = vmul.f32 %v2653_v11, %v2699_v26  ;;  %v1569_v55 = vmul.f32 %v2653_v11, %v2706_v29 }
  0x19   : > { %v751_v56 = vadd.f32 %v729_v49, %v531_v48  ;;  %v1167_v57 = vsel %vm568_vm0, %v1165_v46, %v1166_v50  ;;  %v1386_v58 = vrot.slane %v1350_v51, 2  ;;  %v1787_v59 = vmul.f32 %v2656_v12, %v2709_v30 }
  0x1a   : > { %v1604_v60 = vrot.slane %v1568_v54, 2  ;;  %v1605_v61 = vrot.slane %v1569_v55, 2  ;;  %v1788_v62 = vmul.f32 %v2656_v12, %v2712_v31  ;;  %v404_v63 = vmul.f32 %v2673_v18, %v2693_v24 }
  0x1b   : > { %v970_v0 = vadd.f32 %v948_v52, %v751_v56  ;;  %v1387_v1 = vsel %vm1226_vm1, %v1385_v53, %v1386_v58  ;;  %v1823_v2 = vrot.slane %v1787_v59, 2  ;;  %v455_v3 = vmul.f32 %v2682_v20, %v2699_v26  ;;  %v2777_v58 = vld [vmem:[%s2680_s22 + $0x70] sm:$0xff] }
  0x1c   : > { %v1606_v14 = vsel %vm1226_vm1, %v1604_v60, %v1605_v61  ;;  %v1824_v16 = vrot.slane %v1788_v62, 2  ;;  %v506_v32 = vmul.f32 %v2685_v21, %v2709_v30  ;;  %v618_v33 = vmul.f32 %v2675_v19, %v2693_v24 }
  0x1d   : > { %v1189_v34 = vadd.f32 %v1167_v57, %v970_v0  ;;  %v463_v35 = vadd.f32 %v455_v3, %v404_v63  ;;  %v619_v36 = vmul.f32 %v2675_v19, %v2696_v25  ;;  %v837_v37 = vmul.f32 %v2687_v22, %v2699_v26  ;;  %v2782_v63 = vld [vmem:[%s2680_s22 + $0x80] sm:$0xff] }
  0x1e   : > { %v1825_v38 = vsel %vm1226_vm1, %v1823_v2, %v1824_v16  ;;  %v654_v39 = vrot.slane %v618_v33, 1  ;;  %v838_v40 = vmul.f32 %v2687_v22, %v2706_v29  ;;  %v1056_v41 = vmul.f32 %v2690_v23, %v2709_v30 }
  0x1f   : > { %v1409_v42 = vadd.f32 %v1387_v1, %v1189_v34  ;;  %v514_v43 = vadd.f32 %v506_v32, %v463_v35  ;;  %v655_v44 = vrot.slane %v619_v36, 1  ;;  %v873_v45 = vrot.slane %v837_v37, 1  ;;  %v2799_v36 = vld [vmem:[%s2680_s22 + $0x78] sm:$0x3] }
  0x20   : > { %v874_v46 = vrot.slane %v838_v40, 1  ;;  %v1057_v47 = vmul.f32 %v2690_v23, %v2712_v31  ;;  %v1092_v48 = vrot.slane %v1056_v41, 1  ;;  %v1276_v49 = vmul.f32 %v2701_v27, %v2693_v24 }
  0x21   : > { %v1628_v50 = vadd.f32 %v1606_v14, %v1409_v42  ;;  %v656_v51 = vsel %vm568_vm0, %v654_v39, %v655_v44  ;;  %v1277_v52 = vmul.f32 %v2701_v27, %v2696_v25  ;;  %v1495_v53 = vmul.f32 %v2703_v28, %v2699_v26 }
  0x22   : > { %v678_v54 = vadd.f32 %v656_v51, %v514_v43  ;;  %v875_v55 = vsel %vm568_vm0, %v873_v45, %v874_v46  ;;  %v1093_v56 = vrot.slane %v1057_v47, 1  ;;  %v1312_v57 = vrot.slane %v1276_v49, 2  ;;  %v2807_v45 = vld [vmem:[%s2680_s22 + $0x88] sm:$0x3] }
  0x23   : > { %v1847_v59 = vadd.f32 %v1825_v38, %v1628_v50  ;;  %v1313_v60 = vrot.slane %v1277_v52, 2  ;;  %v1496_v61 = vmul.f32 %v2703_v28, %v2706_v29  ;;  %v1531_v62 = vrot.slane %v1495_v53, 2 }
  0x24   : > { %v897_v0 = vadd.f32 %v875_v55, %v678_v54  ;;  %v1094_v1 = vsel %vm568_vm0, %v1092_v48, %v1093_v56  ;;  %v2786_v2 = vperm.slane %v2671_v17, 2  ;;  %v423_v3 = vmul.f32 %v2639_v4, %v2709_v30 }
  0x25   : > { %v1890_v14 = vadd.f32 %v2658_v13, %v1847_v59  ;;  %v1314_v16 = vsel %vm1226_vm1, %v1312_v57, %v1313_v60  ;;  %v1532_v32 = vrot.slane %v1496_v61, 2  ;;  %v474_v33 = vmul.f32 %v2641_v5, %v2777_v58 }
  0x26   : > { %v1116_v34 = vadd.f32 %v1094_v1, %v897_v0  ;;  %v1714_v35 = vmul.f32 %v2786_v2, %v2709_v30  ;;  %v1715_v17 = vmul.f32 %v2786_v2, %v2712_v31  ;;  %v525_v37 = vmul.f32 %v2643_v6, %v2782_v63 }
  0x27   : > { %v1898_v38 = vmax.f32 %v1890_v14, 0.0  ;;  %v1533_v39 = vsel %vm1226_vm1, %v1531_v62, %v1532_v32  ;;  %v482_v40 = vadd.f32 %v474_v33, %v423_v3  ;;  %v695_v41 = vmul.f32 %v2645_v7, %v2709_v30 }
  0x28   : > { %v1336_v42 = vadd.f32 %v1314_v16, %v1116_v34  ;;  %v1750_v43 = vrot.slane %v1714_v35, 2  ;;  %v1751_v44 = vrot.slane %v1715_v17, 2  ;;  %v696_v46 = vmul.f32 %v2645_v7, %v2712_v31 }
  0x29   : > { %1950 = vrot.lane.b32.xlu1 %v1898_v38, %s2560_s23  ;;  %v533_v47 = vadd.f32 %v525_v37, %v482_v40  ;;  %v733_v48 = vrot.slane %v695_v41, 1  ;;  %v914_v49 = vmul.f32 %v2647_v8, %v2777_v58  ;;  %v915_v50 = vmul.f32 %v2647_v8, %v2799_v36 }
  0x2a   : > { %v1555_v51 = vadd.f32 %v1533_v39, %v1336_v42  ;;  %v1752_v52 = vsel %vm1226_vm1, %v1750_v43, %v1751_v44  ;;  %v734_v53 = vrot.slane %v696_v46, 1  ;;  %v1133_v54 = vmul.f32 %v2649_v9, %v2782_v63 }
  0x2b   : > { %v952_v55 = vrot.slane %v914_v49, 1  ;;  %v953_v56 = vrot.slane %v915_v50, 1  ;;  %v1134_v57 = vmul.f32 %v2649_v9, %v2807_v45  ;;  %v1353_v59 = vmul.f32 %v2651_v10, %v2709_v30 }
  0x2c   : > { %v1774_v60 = vadd.f32 %v1752_v52, %v1555_v51  ;;  %v735_v61 = vsel %vm568_vm0, %v733_v48, %v734_v53  ;;  %v1171_v62 = vrot.slane %v1133_v54, 1  ;;  %v1354_v0 = vmul.f32 %v2651_v10, %v2712_v31 }
  0x2d   : > { %v753_v1 = vadd.f32 %v735_v61, %v533_v47  ;;  %v954_v3 = vsel %vm568_vm0, %v952_v55, %v953_v56  ;;  %v1172_v14 = vrot.slane %v1134_v57, 1  ;;  %v1391_v16 = vrot.slane %v1353_v59, 2 }
  0x2e   : > { %v1873_v32 = vadd.f32 %v2663_v15, %v1774_v60  ;;  %v1392_v33 = vrot.slane %v1354_v0, 2  ;;  %v1572_v34 = vmul.f32 %v2653_v11, %v2777_v58  ;;  %v1573_v35 = vmul.f32 %v2653_v11, %v2799_v36 }
  0x2f   : > { %v972_v17 = vadd.f32 %v954_v3, %v753_v1  ;;  %v1173_v37 = vsel %vm568_vm0, %v1171_v62, %v1172_v14  ;;  %v1791_v38 = vmul.f32 %v2656_v12, %v2782_v63  ;;  %v1792_v39 = vmul.f32 %v2656_v12, %v2807_v45 }
  0x30   : > { %v1881_v40 = vmax.f32 %v1873_v32, 0.0  ;;  %v1393_v41 = vsel %vm1226_vm1, %v1391_v16, %v1392_v33  ;;  %v1610_v42 = vrot.slane %v1572_v34, 2  ;;  %v1611_v43 = vrot.slane %v1573_v35, 2 }
  0x31   : > { %v1191_v44 = vadd.f32 %v1173_v37, %v972_v17  ;;  %v1829_v46 = vrot.slane %v1791_v38, 2  ;;  %v1830_v47 = vrot.slane %v1792_v39, 2  ;;  %v406_v48 = vmul.f32 %v2673_v18, %v2709_v30 }
  0x32   : > { %1918 = vrot.lane.b32.xlu0 %v1881_v40, %s2561_s28  ;;  %v1612_v49 = vsel %vm1226_vm1, %v1610_v42, %v1611_v43  ;;  %v457_v50 = vmul.f32 %v2682_v20, %v2777_v58  ;;  %v508_v51 = vmul.f32 %v2685_v21, %v2782_v63  ;;  %v622_v52 = vmul.f32 %v2675_v19, %v2709_v30  ;;  %v2868_v42 = vld [vmem:[%s2680_s22 + $0x20] sm:$0xff] }
  0x33   : > { %v1411_v53 = vadd.f32 %v1393_v41, %v1191_v44  ;;  %v1831_v54 = vsel %vm1226_vm1, %v1829_v46, %v1830_v47  ;;  %v623_v55 = vmul.f32 %v2675_v19, %v2712_v31  ;;  %v841_v56 = vmul.f32 %v2687_v22, %v2777_v58 }
  0x34   : > { %v465_v57 = vadd.f32 %v457_v50, %v406_v48  ;;  %v660_v59 = vrot.slane %v622_v52, 1  ;;  %v842_v60 = vmul.f32 %v2687_v22, %v2799_v36  ;;  %v1060_v61 = vmul.f32 %v2690_v23, %v2782_v63  ;;  %v2875_v48 = vld [vmem:[%s2680_s22 + $0x30] sm:$0xff] }
  0x35   : > { %v1630_v62 = vadd.f32 %v1612_v49, %v1411_v53  ;;  %v661_v0 = vrot.slane %v623_v55, 1  ;;  %v879_v1 = vrot.slane %v841_v56, 1  ;;  %v1061_v3 = vmul.f32 %v2690_v23, %v2807_v45  ;;  %v2882_v53 = vld [vmem:[%s2680_s22 + $0x28] sm:$0x3] }
  0x36   : > { %v516_v14 = vadd.f32 %v508_v51, %v465_v57  ;;  %v880_v16 = vrot.slane %v842_v60, 1  ;;  %v1098_v32 = vrot.slane %v1060_v61, 1  ;;  %v1280_v33 = vmul.f32 %v2701_v27, %v2709_v30 }
  0x37   : > { %v1849_v34 = vadd.f32 %v1831_v54, %v1630_v62  ;;  %v662_v35 = vsel %vm568_vm0, %v660_v59, %v661_v0  ;;  %v1099_v17 = vrot.slane %v1061_v3, 1  ;;  %v1281_v37 = vmul.f32 %v2701_v27, %v2712_v31  ;;  %v2888_v62 = vld [vmem:[%s2680_s22 + $0x38] sm:$0x3] }
  0x38   : > { %v680_v38 = vadd.f32 %v662_v35, %v516_v14  ;;  %v881_v39 = vsel %vm568_vm0, %v879_v1, %v880_v16  ;;  %v1318_v40 = vrot.slane %v1280_v33, 2  ;;  %v1499_v41 = vmul.f32 %v2703_v28, %v2777_v58 }
  0x39   : > { %v1892_v43 = vadd.f32 %v2658_v13, %v1849_v34  ;;  %v1100_v44 = vsel %vm568_vm0, %v1098_v32, %v1099_v17  ;;  %v1319_v46 = vrot.slane %v1281_v37, 2  ;;  %v1500_v47 = vmul.f32 %v2703_v28, %v2799_v36 }
  0x3a   : > { %v899_v49 = vadd.f32 %v881_v39, %v680_v38  ;;  %v1537_v50 = vrot.slane %v1499_v41, 2  ;;  %v1718_v51 = vmul.f32 %v2786_v2, %v2782_v63  ;;  %v1719_v52 = vmul.f32 %v2786_v2, %v2807_v45 }
  0x3b   : > { %v1900_v54 = vmax.f32 %v1892_v43, 0.0  ;;  %v1320_v55 = vsel %vm1226_vm1, %v1318_v40, %v1319_v46  ;;  %v1538_v56 = vrot.slane %v1500_v47, 2  ;;  %v419_v57 = vmul.f32 %v2639_v4, %v2868_v42 }
  0x3c   : > { %v1118_v59 = vadd.f32 %v1100_v44, %v899_v49  ;;  %v1756_v60 = vrot.slane %v1718_v51, 2  ;;  %v1757_v61 = vrot.slane %v1719_v52, 2  ;;  %v470_v0 = vmul.f32 %v2641_v5, %v2875_v48 }
  0x3d   : > { %1954 = vrot.lane.b32.xlu1 %v1900_v54, %s2560_s23  ;;  %v1539_v1 = vsel %vm1226_vm1, %v1537_v50, %v1538_v56  ;;  %v521_v3 = vmul.f32 %v2643_v6, %v2693_v24  ;;  %v687_v14 = vmul.f32 %v2645_v7, %v2868_v42  ;;  %v688_v16 = vmul.f32 %v2645_v7, %v2882_v53 }
  0x3e   : > { %v1338_v32 = vadd.f32 %v1320_v55, %v1118_v59  ;;  %v1758_v33 = vsel %vm1226_vm1, %v1756_v60, %v1757_v61  ;;  %v478_v34 = vadd.f32 %v470_v0, %v419_v57  ;;  %v906_v35 = vmul.f32 %v2647_v8, %v2875_v48  ;;  %v2920_v61 = vld [vmem:[%s2680_s22] sm:$0xff] }
  0x3f   : > { %v721_v17 = vrot.slane %v687_v14, 1  ;;  %v722_v37 = vrot.slane %v688_v16, 1  ;;  %v907_v38 = vmul.f32 %v2647_v8, %v2888_v62  ;;  %v1125_v39 = vmul.f32 %v2649_v9, %v2693_v24  ;;  %v2925_v16 = vld [vmem:[%s2680_s22 + $0x10] sm:$0xff] }
  0x40   : > { %v1557_v40 = vadd.f32 %v1539_v1, %v1338_v32  ;;  %v529_v41 = vadd.f32 %v521_v3, %v478_v34  ;;  %v940_v43 = vrot.slane %v906_v35, 1  ;;  %v1126_v44 = vmul.f32 %v2649_v9, %v2696_v25 }
  0x41   : > { %v723_v46 = vsel %vm568_vm0, %v721_v17, %v722_v37  ;;  %v941_v47 = vrot.slane %v907_v38, 1  ;;  %v1159_v49 = vrot.slane %v1125_v39, 1  ;;  %v1345_v50 = vmul.f32 %v2651_v10, %v2868_v42  ;;  %v2932_v17 = vld [vmem:[%s2680_s22 + $0x8] sm:$0x3] }
  0x42   : > { %v1776_v51 = vadd.f32 %v1758_v33, %v1557_v40  ;;  %v749_v52 = vadd.f32 %v723_v46, %v529_v41  ;;  %v1160_v54 = vrot.slane %v1126_v44, 1  ;;  %v1346_v55 = vmul.f32 %v2651_v10, %v2882_v53  ;;  %v2936_v40 = vld [vmem:[%s2680_s22 + $0x18] sm:$0x3] }
  0x43   : > { %v942_v56 = vsel %vm568_vm0, %v940_v43, %v941_v47  ;;  %v1379_v57 = vrot.slane %v1345_v50, 2  ;;  %v1564_v59 = vmul.f32 %v2653_v11, %v2875_v48  ;;  %v1565_v60 = vmul.f32 %v2653_v11, %v2888_v62 }
  0x44   : > { %v1875_v0 = vadd.f32 %v2663_v15, %v1776_v51  ;;  %v968_v1 = vadd.f32 %v942_v56, %v749_v52  ;;  %v1161_v3 = vsel %vm568_vm0, %v1159_v49, %v1160_v54  ;;  %v1380_v14 = vrot.slane %v1346_v55, 2 }
  0x45   : > { %v1598_v32 = vrot.slane %v1564_v59, 2  ;;  %v1599_v33 = vrot.slane %v1565_v60, 2  ;;  %v1783_v34 = vmul.f32 %v2656_v12, %v2693_v24  ;;  %v1784_v35 = vmul.f32 %v2656_v12, %v2696_v25 }
  0x46   : > { %v1883_v37 = vmax.f32 %v1875_v0, 0.0  ;;  %v1187_v38 = vadd.f32 %v1161_v3, %v968_v1  ;;  %v1381_v39 = vsel %vm1226_vm1, %v1379_v57, %v1380_v14  ;;  %v417_v41 = vmul.f32 %v2639_v4, %v2920_v61 }
  0x47   : > { %v1600_v43 = vsel %vm1226_vm1, %v1598_v32, %v1599_v33  ;;  %v1817_v44 = vrot.slane %v1783_v34, 2  ;;  %v1818_v46 = vrot.slane %v1784_v35, 2  ;;  %v468_v47 = vmul.f32 %v2641_v5, %v2925_v16 }
  0x48   : > { %1922 = vrot.lane.b32.xlu0 %v1883_v37, %s2561_s28  ;;  %v1407_v49 = vadd.f32 %v1381_v39, %v1187_v38  ;;  %v519_v50 = vmul.f32 %v2643_v6, %v2868_v42  ;;  %v683_v51 = vmul.f32 %v2645_v7, %v2920_v61  ;;  %v684_v52 = vmul.f32 %v2645_v7, %v2932_v17 }
  0x49   : > { %v1819_v54 = vsel %vm1226_vm1, %v1817_v44, %v1818_v46  ;;  %v476_v55 = vadd.f32 %v468_v47, %v417_v41  ;;  %v902_v56 = vmul.f32 %v2647_v8, %v2925_v16  ;;  %v903_v57 = vmul.f32 %v2647_v8, %v2936_v40 }
  0x4a   : > { %v1626_v59 = vadd.f32 %v1600_v43, %v1407_v49  ;;  %v715_v60 = vrot.slane %v683_v51, 1  ;;  %v716_v0 = vrot.slane %v684_v52, 1  ;;  %v1121_v1 = vmul.f32 %v2649_v9, %v2868_v42 }
  0x4b   : > { %v527_v3 = vadd.f32 %v519_v50, %v476_v55  ;;  %v934_v14 = vrot.slane %v902_v56, 1  ;;  %v935_v32 = vrot.slane %v903_v57, 1  ;;  %v1122_v33 = vmul.f32 %v2649_v9, %v2882_v53 }
  0x4c   : > { %v1845_v34 = vadd.f32 %v1819_v54, %v1626_v59  ;;  %v717_v35 = vsel %vm568_vm0, %v715_v60, %v716_v0  ;;  %v1153_v37 = vrot.slane %v1121_v1, 1  ;;  %v1341_v38 = vmul.f32 %v2651_v10, %v2920_v61 }
  0x4d   : > { %v747_v39 = vadd.f32 %v717_v35, %v527_v3  ;;  %v936_v41 = vsel %vm568_vm0, %v934_v14, %v935_v32  ;;  %v1154_v43 = vrot.slane %v1122_v33, 1  ;;  %v1342_v44 = vmul.f32 %v2651_v10, %v2932_v17 }
  0x4e   : > { %v1888_v46 = vadd.f32 %v2658_v13, %v1845_v34  ;;  %v1373_v47 = vrot.slane %v1341_v38, 2  ;;  %v1560_v49 = vmul.f32 %v2653_v11, %v2925_v16  ;;  %v1561_v50 = vmul.f32 %v2653_v11, %v2936_v40 }
  0x4f   : > { %v966_v51 = vadd.f32 %v936_v41, %v747_v39  ;;  %v1155_v52 = vsel %vm568_vm0, %v1153_v37, %v1154_v43  ;;  %v1374_v54 = vrot.slane %v1342_v44, 2  ;;  %v1779_v55 = vmul.f32 %v2656_v12, %v2868_v42 }
  0x50   : > { %v1896_v56 = vmax.f32 %v1888_v46, 0.0  ;;  %v1592_v57 = vrot.slane %v1560_v49, 2  ;;  %v1593_v59 = vrot.slane %v1561_v50, 2  ;;  %v1780_v60 = vmul.f32 %v2656_v12, %v2882_v53 }
  0x51   : > { %v1185_v0 = vadd.f32 %v1155_v52, %v966_v51  ;;  %v1375_v1 = vsel %vm1226_vm1, %v1373_v47, %v1374_v54  ;;  %v1811_v3 = vrot.slane %v1779_v55, 2  ;;  %v400_v14 = vmul.f32 %v2673_v18, %v2920_v61 }
  0x52   : > { %1946 = vrot.lane.b32.xlu1 %v1896_v56, %s2560_s23  ;;  %v1594_v32 = vsel %vm1226_vm1, %v1592_v57, %v1593_v59  ;;  %v1812_v33 = vrot.slane %v1780_v60, 2  ;;  %v451_v34 = vmul.f32 %v2682_v20, %v2925_v16  ;;  %v502_v35 = vmul.f32 %v2685_v21, %v2868_v42 }
  0x53   : > { %v1405_v37 = vadd.f32 %v1375_v1, %v1185_v0  ;;  %v610_v38 = vmul.f32 %v2675_v19, %v2920_v61  ;;  %v611_v39 = vmul.f32 %v2675_v19, %v2932_v17  ;;  %v829_v41 = vmul.f32 %v2687_v22, %v2925_v16 }
  0x54   : > { %v1813_v43 = vsel %vm1226_vm1, %v1811_v3, %v1812_v33  ;;  %v459_v44 = vadd.f32 %v451_v34, %v400_v14  ;;  %v830_v46 = vmul.f32 %v2687_v22, %v2936_v40  ;;  %v1048_v47 = vmul.f32 %v2690_v23, %v2868_v42 }
  0x55   : > { %v1624_v49 = vadd.f32 %v1594_v32, %v1405_v37  ;;  %v642_v50 = vrot.slane %v610_v38, 1  ;;  %v643_v51 = vrot.slane %v611_v39, 1  ;;  %v861_v52 = vrot.slane %v829_v41, 1 }
  0x56   : > { %v510_v54 = vadd.f32 %v502_v35, %v459_v44  ;;  %v862_v55 = vrot.slane %v830_v46, 1  ;;  %v1049_v56 = vmul.f32 %v2690_v23, %v2882_v53  ;;  %v1080_v57 = vrot.slane %v1048_v47, 1 }
  0x57   : > { %v1843_v59 = vadd.f32 %v1813_v43, %v1624_v49  ;;  %v644_v60 = vsel %vm568_vm0, %v642_v50, %v643_v51  ;;  %v1268_v0 = vmul.f32 %v2701_v27, %v2920_v61  ;;  %v1269_v1 = vmul.f32 %v2701_v27, %v2932_v17 }
  0x58   : > { %v674_v3 = vadd.f32 %v644_v60, %v510_v54  ;;  %v863_v14 = vsel %vm568_vm0, %v861_v52, %v862_v55  ;;  %v1081_v32 = vrot.slane %v1049_v56, 1  ;;  %v1487_v33 = vmul.f32 %v2703_v28, %v2925_v16 }
  0x59   : > { %v1886_v34 = vadd.f32 %v2658_v13, %v1843_v59  ;;  %v1300_v35 = vrot.slane %v1268_v0, 2  ;;  %v1301_v37 = vrot.slane %v1269_v1, 2  ;;  %v1488_v38 = vmul.f32 %v2703_v28, %v2936_v40 }
  0x5a   : > { %v893_v39 = vadd.f32 %v863_v14, %v674_v3  ;;  %v1082_v61 = vsel %vm568_vm0, %v1080_v57, %v1081_v32  ;;  %v1519_v41 = vrot.slane %v1487_v33, 2  ;;  %v1706_v17 = vmul.f32 %v2786_v2, %v2868_v42 }
  0x5b   : > { %v1894_v43 = vmax.f32 %v1886_v34, 0.0  ;;  %v1302_v44 = vsel %vm1226_vm1, %v1300_v35, %v1301_v37  ;;  %v1520_v46 = vrot.slane %v1488_v38, 2  ;;  %v1707_v47 = vmul.f32 %v2786_v2, %v2882_v53 }
  0x5c   : > { %v1112_v49 = vadd.f32 %v1082_v61, %v893_v39  ;;  %v1738_v50 = vrot.slane %v1706_v17, 2  ;;  %v402_v51 = vmul.f32 %v2673_v18, %v2868_v42  ;;  %v453_v52 = vmul.f32 %v2682_v20, %v2875_v48 }
  0x5d   : > { %1942 = vrot.lane.b32.xlu0 %v1894_v43, %s2560_s23  ;;  %v1521_v54 = vsel %vm1226_vm1, %v1519_v41, %v1520_v46  ;;  %v1739_v55 = vrot.slane %v1707_v47, 2  ;;  %v504_v56 = vmul.f32 %v2685_v21, %v2693_v24  ;;  %v614_v57 = vmul.f32 %v2675_v19, %v2868_v42 }
  0x5e   : > { %v1332_v59 = vadd.f32 %v1302_v44, %v1112_v49  ;;  %v461_v60 = vadd.f32 %v453_v52, %v402_v51  ;;  %v615_v0 = vmul.f32 %v2675_v19, %v2882_v53  ;;  %v833_v1 = vmul.f32 %v2687_v22, %v2875_v48 }
  0x5f   : > { %v1740_v3 = vsel %vm1226_vm1, %v1738_v50, %v1739_v55  ;;  %v648_v14 = vrot.slane %v614_v57, 1  ;;  %v834_v32 = vmul.f32 %v2687_v22, %v2888_v62  ;;  %v1052_v33 = vmul.f32 %v2690_v23, %v2693_v24 }
  0x60   : > { %v1551_v34 = vadd.f32 %v1521_v54, %v1332_v59  ;;  %v512_v35 = vadd.f32 %v504_v56, %v461_v60  ;;  %v649_v37 = vrot.slane %v615_v0, 1  ;;  %v867_v38 = vrot.slane %v833_v1, 1 }
  0x61   : > { %v868_v39 = vrot.slane %v834_v32, 1  ;;  %v1053_v61 = vmul.f32 %v2690_v23, %v2696_v25  ;;  %v1086_v41 = vrot.slane %v1052_v33, 1  ;;  %v1272_v17 = vmul.f32 %v2701_v27, %v2868_v42 }
  0x62   : > { %v1770_v43 = vadd.f32 %v1740_v3, %v1551_v34  ;;  %v650_v44 = vsel %vm568_vm0, %v648_v14, %v649_v37  ;;  %v1273_v46 = vmul.f32 %v2701_v27, %v2882_v53  ;;  %v1491_v47 = vmul.f32 %v2703_v28, %v2875_v48  ;;  %v3052_v3 = vld [vmem:[%s2680_s22 + $0x90] sm:$0xff] }
  0x63   : > { %v676_v49 = vadd.f32 %v650_v44, %v512_v35  ;;  %v869_v50 = vsel %vm568_vm0, %v867_v38, %v868_v39  ;;  %v1087_v51 = vrot.slane %v1053_v61, 1  ;;  %v1306_v52 = vrot.slane %v1272_v17, 2 }
  0x64   : > { %v1869_v54 = vadd.f32 %v2663_v15, %v1770_v43  ;;  %v1307_v55 = vrot.slane %v1273_v46, 2  ;;  %v1492_v56 = vmul.f32 %v2703_v28, %v2888_v62  ;;  %v1525_v57 = vrot.slane %v1491_v47, 2 }
  0x65   : > { %v895_v59 = vadd.f32 %v869_v50, %v676_v49  ;;  %v1088_v60 = vsel %vm568_vm0, %v1086_v41, %v1087_v51  ;;  %v1710_v0 = vmul.f32 %v2786_v2, %v2693_v24  ;;  %v1711_v1 = vmul.f32 %v2786_v2, %v2696_v25  ;;  %v3062_v41 = vld [vmem:[%s2680_s22 + $0x98] sm:$0x3] }
  0x66   : > { %v1877_v14 = vmax.f32 %v1869_v54, 0.0  ;;  %v1308_v32 = vsel %vm1226_vm1, %v1306_v52, %v1307_v55  ;;  %v1526_v33 = vrot.slane %v1492_v56, 2  ;;  %v407_v34 = vmul.f32 %v2673_v18, %v2777_v58 }
  0x67   : > { %v1114_v35 = vadd.f32 %v1088_v60, %v895_v59  ;;  %v1744_v37 = vrot.slane %v1710_v0, 2  ;;  %v1745_v38 = vrot.slane %v1711_v1, 2  ;;  %v458_v39 = vmul.f32 %v2682_v20, %v2782_v63 }
  0x68   : > { %1910 = vrot.lane.b32.xlu2 %v1877_v14, %s2561_s28  ;;  %v1527_v61 = vsel %vm1226_vm1, %v1525_v57, %v1526_v33  ;;  %v509_v17 = vmul.f32 %v2685_v21, %v3052_v3  ;;  %v624_v43 = vmul.f32 %v2675_v19, %v2777_v58  ;;  %v625_v44 = vmul.f32 %v2675_v19, %v2799_v36 }
  0x69   : > { %v1334_v46 = vadd.f32 %v1308_v32, %v1114_v35  ;;  %v1746_v47 = vsel %vm1226_vm1, %v1744_v37, %v1745_v38  ;;  %v466_v49 = vadd.f32 %v458_v39, %v407_v34  ;;  %v843_v50 = vmul.f32 %v2687_v22, %v2782_v63 }
  0x6a   : > { %v663_v51 = vrot.slane %v624_v43, 1  ;;  %v664_v52 = vrot.slane %v625_v44, 1  ;;  %v844_v54 = vmul.f32 %v2687_v22, %v2807_v45  ;;  %v1062_v55 = vmul.f32 %v2690_v23, %v3052_v3 }
  0x6b   : > { %v1553_v56 = vadd.f32 %v1527_v61, %v1334_v46  ;;  %v517_v57 = vadd.f32 %v509_v17, %v466_v49  ;;  %v882_v59 = vrot.slane %v843_v50, 1  ;;  %v1063_v60 = vmul.f32 %v2690_v23, %v3062_v41 }
  0x6c   : > { %v665_v0 = vsel %vm568_vm0, %v663_v51, %v664_v52  ;;  %v883_v1 = vrot.slane %v844_v54, 1  ;;  %v1101_v14 = vrot.slane %v1062_v55, 1  ;;  %v1282_v32 = vmul.f32 %v2701_v27, %v2777_v58 }
  0x6d   : > { %v1772_v33 = vadd.f32 %v1746_v47, %v1553_v56  ;;  %v681_v34 = vadd.f32 %v665_v0, %v517_v57  ;;  %v1102_v35 = vrot.slane %v1063_v60, 1  ;;  %v1283_v37 = vmul.f32 %v2701_v27, %v2799_v36 }
  0x6e   : > { %v884_v38 = vsel %vm568_vm0, %v882_v59, %v883_v1  ;;  %v1321_v39 = vrot.slane %v1282_v32, 2  ;;  %v1501_v61 = vmul.f32 %v2703_v28, %v2782_v63  ;;  %v1502_v17 = vmul.f32 %v2703_v28, %v2807_v45 }
  0x6f   : > { %v1871_v43 = vadd.f32 %v2663_v15, %v1772_v33  ;;  %v900_v44 = vadd.f32 %v884_v38, %v681_v34  ;;  %v1103_v46 = vsel %vm568_vm0, %v1101_v14, %v1102_v35  ;;  %v1322_v47 = vrot.slane %v1283_v37, 2 }
  0x70   : > { %v1540_v49 = vrot.slane %v1501_v61, 2  ;;  %v1541_v50 = vrot.slane %v1502_v17, 2  ;;  %v1720_v51 = vmul.f32 %v2786_v2, %v3052_v3  ;;  %v1721_v52 = vmul.f32 %v2786_v2, %v3062_v41 }
  0x71   : > { %v1879_v54 = vmax.f32 %v1871_v43, 0.0  ;;  %v1119_v55 = vadd.f32 %v1103_v46, %v900_v44  ;;  %v1323_v63 = vsel %vm1226_vm1, %v1321_v39, %v1322_v47  ;;  %v422_v45 = vmul.f32 %v2639_v4, %v2699_v26 }
  0x72   : > { %v1542_v56 = vsel %vm1226_vm1, %v1540_v49, %v1541_v50  ;;  %v1759_v57 = vrot.slane %v1720_v51, 2  ;;  %v1760_v59 = vrot.slane %v1721_v52, 2  ;;  %v473_v60 = vmul.f32 %v2641_v5, %v2709_v30 }
  0x73   : > { %1914 = vrot.lane.b32.xlu2 %v1879_v54, %s2561_s28  ;;  %v1339_v0 = vadd.f32 %v1323_v63, %v1119_v55  ;;  %v524_v1 = vmul.f32 %v2643_v6, %v2777_v58  ;;  %v693_v14 = vmul.f32 %v2645_v7, %v2699_v26  ;;  %v694_v32 = vmul.f32 %v2645_v7, %v2706_v29 }
  0x74   : > { %v1761_v33 = vsel %vm1226_vm1, %v1759_v57, %v1760_v59  ;;  %v481_v34 = vadd.f32 %v473_v60, %v422_v45  ;;  %v912_v35 = vmul.f32 %v2647_v8, %v2709_v30  ;;  %v913_v37 = vmul.f32 %v2647_v8, %v2712_v31 }
  0x75   : > { %v1558_v38 = vadd.f32 %v1542_v56, %v1339_v0  ;;  %v730_v39 = vrot.slane %v693_v14, 1  ;;  %v731_v61 = vrot.slane %v694_v32, 1  ;;  %v1131_v17 = vmul.f32 %v2649_v9, %v2777_v58 }
  0x76   : > { %v532_v43 = vadd.f32 %v524_v1, %v481_v34  ;;  %v949_v44 = vrot.slane %v912_v35, 1  ;;  %v950_v46 = vrot.slane %v913_v37, 1  ;;  %v1132_v47 = vmul.f32 %v2649_v9, %v2799_v36 }
  0x77   : > { %v1777_v49 = vadd.f32 %v1761_v33, %v1558_v38  ;;  %v732_v50 = vsel %vm568_vm0, %v730_v39, %v731_v61  ;;  %v1168_v51 = vrot.slane %v1131_v17, 1  ;;  %v1351_v52 = vmul.f32 %v2651_v10, %v2699_v26 }
  0x78   : > { %v752_v54 = vadd.f32 %v732_v50, %v532_v43  ;;  %v951_v55 = vsel %vm568_vm0, %v949_v44, %v950_v46  ;;  %v1169_v63 = vrot.slane %v1132_v47, 1  ;;  %v1352_v45 = vmul.f32 %v2651_v10, %v2706_v29 }
  0x79   : > { %v1876_v56 = vadd.f32 %v2663_v15, %v1777_v49  ;;  %v1388_v57 = vrot.slane %v1351_v52, 2  ;;  %v1570_v59 = vmul.f32 %v2653_v11, %v2709_v30  ;;  %v1571_v60 = vmul.f32 %v2653_v11, %v2712_v31 }
  0x7a   : > { %v971_v0 = vadd.f32 %v951_v55, %v752_v54  ;;  %v1170_v1 = vsel %vm568_vm0, %v1168_v51, %v1169_v63  ;;  %v1389_v14 = vrot.slane %v1352_v45, 2  ;;  %v1789_v32 = vmul.f32 %v2656_v12, %v2777_v58 }
  0x7b   : > { %v1884_v33 = vmax.f32 %v1876_v56, 0.0  ;;  %v1607_v34 = vrot.slane %v1570_v59, 2  ;;  %v1608_v35 = vrot.slane %v1571_v60, 2  ;;  %v1790_v29 = vmul.f32 %v2656_v12, %v2799_v36 }
  0x7c   : > { %v1190_v37 = vadd.f32 %v1170_v1, %v971_v0  ;;  %v1390_v38 = vsel %vm1226_vm1, %v1388_v57, %v1389_v14  ;;  %v1826_v30 = vrot.slane %v1789_v32, 2  ;;  %v401_v31 = vmul.f32 %v2673_v18, %v2925_v16 }
  0x7d   : > { %1924 = vrot.lane.b32.xlu0 %v1884_v33, %s2561_s28  ;;  %v1609_v39 = vsel %vm1226_vm1, %v1607_v34, %v1608_v35  ;;  %v1827_v61 = vrot.slane %v1790_v29, 2  ;;  %v452_v58 = vmul.f32 %v2682_v20, %v2868_v42  ;;  %v503_v17 = vmul.f32 %v2685_v21, %v2875_v48 }
  0x7e   : > { %v1410_v43 = vadd.f32 %v1390_v38, %v1190_v37  ;;  %v612_v36 = vmul.f32 %v2675_v19, %v2925_v16  ;;  %v613_v44 = vmul.f32 %v2675_v19, %v2936_v40  ;;  %v831_v46 = vmul.f32 %v2687_v22, %v2868_v42 }
  0x7f   : > { %v1828_v47 = vsel %vm1226_vm1, %v1826_v30, %v1827_v61  ;;  %v460_v49 = vadd.f32 %v452_v58, %v401_v31  ;;  %v832_v50 = vmul.f32 %v2687_v22, %v2882_v53  ;;  %v1050_v51 = vmul.f32 %v2690_v23, %v2875_v48 }
  0x80   : > { %v1629_v52 = vadd.f32 %v1609_v39, %v1410_v43  ;;  %v645_v54 = vrot.slane %v612_v36, 1  ;;  %v646_v55 = vrot.slane %v613_v44, 1  ;;  %v864_v63 = vrot.slane %v831_v46, 1 }
  0x81   : > { %v511_v45 = vadd.f32 %v503_v17, %v460_v49  ;;  %v865_v56 = vrot.slane %v832_v50, 1  ;;  %v1051_v57 = vmul.f32 %v2690_v23, %v2888_v62  ;;  %v1083_v59 = vrot.slane %v1050_v51, 1 }
  0x82   : > { %v1848_v60 = vadd.f32 %v1828_v47, %v1629_v52  ;;  %v647_v0 = vsel %vm568_vm0, %v645_v54, %v646_v55  ;;  %v1270_v1 = vmul.f32 %v2701_v27, %v2925_v16  ;;  %v1271_v14 = vmul.f32 %v2701_v27, %v2936_v40 }
  0x83   : > { %v675_v32 = vadd.f32 %v647_v0, %v511_v45  ;;  %v866_v33 = vsel %vm568_vm0, %v864_v63, %v865_v56  ;;  %v1084_v34 = vrot.slane %v1051_v57, 1  ;;  %v1489_v35 = vmul.f32 %v2703_v28, %v2868_v42 }
  0x84   : > { %v1891_v29 = vadd.f32 %v2658_v13, %v1848_v60  ;;  %v1303_v37 = vrot.slane %v1270_v1, 2  ;;  %v1304_v38 = vrot.slane %v1271_v14, 2  ;;  %v1490_v30 = vmul.f32 %v2703_v28, %v2882_v53 }
  0x85   : > { %v894_v31 = vadd.f32 %v866_v33, %v675_v32  ;;  %v1085_v39 = vsel %vm568_vm0, %v1083_v59, %v1084_v34  ;;  %v1522_v61 = vrot.slane %v1489_v35, 2  ;;  %v1708_v58 = vmul.f32 %v2786_v2, %v2875_v48 }
  0x86   : > { %v1899_v17 = vmax.f32 %v1891_v29, 0.0  ;;  %v1305_v43 = vsel %vm1226_vm1, %v1303_v37, %v1304_v38  ;;  %v1523_v36 = vrot.slane %v1490_v30, 2  ;;  %v1709_v44 = vmul.f32 %v2786_v2, %v2888_v62  ;;  %v3192_v29 = vld [vmem:[%s2680_s22 + $0x58] sm:$0x3] }
  0x87   : > { %v1113_v46 = vadd.f32 %v1085_v39, %v894_v31  ;;  %v1741_v47 = vrot.slane %v1708_v58, 2  ;;  %v403_v49 = vmul.f32 %v2673_v18, %v2875_v48  ;;  %v454_v50 = vmul.f32 %v2682_v20, %v2693_v24  ;;  %v3202_v31 = vld [vmem:[%s2680_s22 + $0x40] sm:$0xff] }
  0x88   : > { %1952 = vrot.lane.b32.xlu1 %v1899_v17, %s2560_s23  ;;  %v1524_v51 = vsel %vm1226_vm1, %v1522_v61, %v1523_v36  ;;  %v1742_v52 = vrot.slane %v1709_v44, 2  ;;  %v505_v54 = vmul.f32 %v2685_v21, %v2699_v26  ;;  %v616_v55 = vmul.f32 %v2675_v19, %v2875_v48 }
  0x89   : > { %v1333_v63 = vadd.f32 %v1305_v43, %v1113_v46  ;;  %v462_v45 = vadd.f32 %v454_v50, %v403_v49  ;;  %v617_v56 = vmul.f32 %v2675_v19, %v2888_v62  ;;  %v835_v57 = vmul.f32 %v2687_v22, %v2693_v24  ;;  %v3209_v46 = vld [vmem:[%s2680_s22 + $0x48] sm:$0x3] }
  0x8a   : > { %v1743_v59 = vsel %vm1226_vm1, %v1741_v47, %v1742_v52  ;;  %v651_v60 = vrot.slane %v616_v55, 1  ;;  %v836_v0 = vmul.f32 %v2687_v22, %v2696_v25  ;;  %v1054_v1 = vmul.f32 %v2690_v23, %v2699_v26  ;;  %v3215_v52 = vld [vmem:[%s2680_s22 + $0x50] sm:$0xff] }
  0x8b   : > { %v1552_v14 = vadd.f32 %v1524_v51, %v1333_v63  ;;  %v513_v32 = vadd.f32 %v505_v54, %v462_v45  ;;  %v652_v33 = vrot.slane %v617_v56, 1  ;;  %v870_v34 = vrot.slane %v835_v57, 1 }
  0x8c   : > { %v871_v35 = vrot.slane %v836_v0, 1  ;;  %v1055_v24 = vmul.f32 %v3192_v29, %v2690_v23  ;;  %v1089_v37 = vrot.slane %v1054_v1, 1  ;;  %v1274_v38 = vmul.f32 %v2701_v27, %v2875_v48 }
  0x8d   : > { %v1771_v30 = vadd.f32 %v1743_v59, %v1552_v14  ;;  %v653_v25 = vsel %vm568_vm0, %v651_v60, %v652_v33  ;;  %v1275_v26 = vmul.f32 %v2701_v27, %v2888_v62  ;;  %v1493_v39 = vmul.f32 %v3202_v31, %v2703_v28 }
  0x8e   : > { %v677_v61 = vadd.f32 %v653_v25, %v513_v32  ;;  %v872_v58 = vsel %vm568_vm0, %v870_v34, %v871_v35  ;;  %v1090_v17 = vrot.slane %v1055_v24, 1  ;;  %v1309_v43 = vrot.slane %v1274_v38, 2 }
  0x8f   : > { %v1870_v36 = vadd.f32 %v2663_v15, %v1771_v30  ;;  %v1310_v44 = vrot.slane %v1275_v26, 2  ;;  %v1494_v47 = vmul.f32 %v3209_v46, %v2703_v28  ;;  %v1528_v49 = vrot.slane %v1493_v39, 2 }
  0x90   : > { %v896_v50 = vadd.f32 %v872_v58, %v677_v61  ;;  %v1091_v51 = vsel %vm568_vm0, %v1089_v37, %v1090_v17  ;;  %v1712_v54 = vmul.f32 %v3215_v52, %v2786_v2  ;;  %v1713_v55 = vmul.f32 %v3192_v29, %v2786_v2 }
  0x91   : > { %v1878_v63 = vmax.f32 %v1870_v36, 0.0  ;;  %v1311_v45 = vsel %vm1226_vm1, %v1309_v43, %v1310_v44  ;;  %v1529_v56 = vrot.slane %v1494_v47, 2  ;;  %v420_v57 = vmul.f32 %v2639_v4, %v2875_v48 }
  0x92   : > { %v1115_v59 = vadd.f32 %v1091_v51, %v896_v50  ;;  %v1747_v60 = vrot.slane %v1712_v54, 2  ;;  %v1748_v0 = vrot.slane %v1713_v55, 2  ;;  %v471_v1 = vmul.f32 %v3202_v31, %v2641_v5 }
  0x93   : > { %1912 = vrot.lane.b32.xlu0 %v1878_v63, %s2561_s28  ;;  %v1530_v14 = vsel %vm1226_vm1, %v1528_v49, %v1529_v56  ;;  %v522_v32 = vmul.f32 %v3215_v52, %v2643_v6  ;;  %v689_v33 = vmul.f32 %v2645_v7, %v2875_v48  ;;  %v690_v34 = vmul.f32 %v2645_v7, %v2888_v62 }
  0x94   : > { %v1335_v35 = vadd.f32 %v1311_v45, %v1115_v59  ;;  %v1749_v24 = vsel %vm1226_vm1, %v1747_v60, %v1748_v0  ;;  %v479_v37 = vadd.f32 %v471_v1, %v420_v57  ;;  %v908_v38 = vmul.f32 %v3202_v31, %v2647_v8 }
  0x95   : > { %v724_v30 = vrot.slane %v689_v33, 1  ;;  %v725_v25 = vrot.slane %v690_v34, 1  ;;  %v909_v26 = vmul.f32 %v3209_v46, %v2647_v8  ;;  %v1127_v39 = vmul.f32 %v3215_v52, %v2649_v9 }
  0x96   : > { %v1554_v61 = vadd.f32 %v1530_v14, %v1335_v35  ;;  %v530_v58 = vadd.f32 %v522_v32, %v479_v37  ;;  %v943_v17 = vrot.slane %v908_v38, 1  ;;  %v1128_v43 = vmul.f32 %v3192_v29, %v2649_v9 }
  0x97   : > { %v726_v36 = vsel %vm568_vm0, %v724_v30, %v725_v25  ;;  %v944_v44 = vrot.slane %v909_v26, 1  ;;  %v1162_v47 = vrot.slane %v1127_v39, 1  ;;  %v1347_v49 = vmul.f32 %v2651_v10, %v2875_v48  ;;  %v3264_v39 = vld [vmem:[%s2680_s22 + $0x60] sm:$0xff] }
  0x98   : > { %v1773_v50 = vadd.f32 %v1749_v24, %v1554_v61  ;;  %v750_v51 = vadd.f32 %v726_v36, %v530_v58  ;;  %v1163_v54 = vrot.slane %v1128_v43, 1  ;;  %v1348_v55 = vmul.f32 %v2651_v10, %v2888_v62 }
  0x99   : > { %v945_v63 = vsel %vm568_vm0, %v943_v17, %v944_v44  ;;  %v1382_v45 = vrot.slane %v1347_v49, 2  ;;  %v1566_v56 = vmul.f32 %v3202_v31, %v2653_v11  ;;  %v1567_v57 = vmul.f32 %v3209_v46, %v2653_v11  ;;  %v3270_v17 = vld [vmem:[%s2680_s22 + $0x70] sm:$0xff]  ;;  %v3282_v49 = vld [vmem:[%s2680_s22 + $0x68] sm:$0x3] }
  0x9a   : > { %v1872_v59 = vadd.f32 %v2663_v15, %v1773_v50  ;;  %v969_v60 = vadd.f32 %v945_v63, %v750_v51  ;;  %v1164_v0 = vsel %vm568_vm0, %v1162_v47, %v1163_v54  ;;  %v1383_v1 = vrot.slane %v1348_v55, 2 }
  0x9b   : > { %v1601_v14 = vrot.slane %v1566_v56, 2  ;;  %v1602_v32 = vrot.slane %v1567_v57, 2  ;;  %v1785_v33 = vmul.f32 %v3215_v52, %v2656_v12  ;;  %v1786_v34 = vmul.f32 %v3192_v29, %v2656_v12  ;;  %v3289_v56 = vld [vmem:[%s2680_s22 + $0x78] sm:$0x3] }
  0x9c   : > { %v1880_v35 = vmax.f32 %v1872_v59, 0.0  ;;  %v1188_v24 = vadd.f32 %v1164_v0, %v969_v60  ;;  %v1384_v37 = vsel %vm1226_vm1, %v1382_v45, %v1383_v1  ;;  %v405_v38 = vmul.f32 %v3215_v52, %v2673_v18 }
  0x9d   : > { %v1603_v30 = vsel %vm1226_vm1, %v1601_v14, %v1602_v32  ;;  %v1820_v25 = vrot.slane %v1785_v33, 2  ;;  %v1821_v26 = vrot.slane %v1786_v34, 2  ;;  %v456_v61 = vmul.f32 %v3264_v39, %v2682_v20 }
  0x9e   : > { %1916 = vrot.lane.b32.xlu1 %v1880_v35, %s2561_s28  ;;  %v1408_v58 = vadd.f32 %v1384_v37, %v1188_v24  ;;  %v507_v43 = vmul.f32 %v3270_v17, %v2685_v21  ;;  %v620_v18 = vmul.f32 %v3215_v52, %v2675_v19  ;;  %v621_v36 = vmul.f32 %v3192_v29, %v2675_v19 }
  0x9f   : > { %v1822_v44 = vsel %vm1226_vm1, %v1820_v25, %v1821_v26  ;;  %v464_v47 = vadd.f32 %v456_v61, %v405_v38  ;;  %v839_v20 = vmul.f32 %v3264_v39, %v2687_v22  ;;  %v840_v50 = vmul.f32 %v3282_v49, %v2687_v22 }
  0xa0   : > { %v1627_v51 = vadd.f32 %v1603_v30, %v1408_v58  ;;  %v657_v54 = vrot.slane %v620_v18, 1  ;;  %v658_v21 = vrot.slane %v621_v36, 1  ;;  %v1058_v55 = vmul.f32 %v3270_v17, %v2690_v23 }
  0xa1   : > { %v515_v63 = vadd.f32 %v507_v43, %v464_v47  ;;  %v876_v45 = vrot.slane %v839_v20, 1  ;;  %v877_v19 = vrot.slane %v840_v50, 1  ;;  %v1059_v57 = vmul.f32 %v3289_v56, %v2690_v23  ;;  %v3315_v20 = vld [vmem:[%s2680_s22 + $0x80] sm:$0xff] }
  0xa2   : > { %v1846_v59 = vadd.f32 %v1822_v44, %v1627_v51  ;;  %v659_v60 = vsel %vm568_vm0, %v657_v54, %v658_v21  ;;  %v1095_v0 = vrot.slane %v1058_v55, 1  ;;  %v1278_v22 = vmul.f32 %v3215_v52, %v2701_v27 }
  0xa3   : > { %v679_v1 = vadd.f32 %v659_v60, %v515_v63  ;;  %v878_v14 = vsel %vm568_vm0, %v876_v45, %v877_v19  ;;  %v1096_v32 = vrot.slane %v1059_v57, 1  ;;  %v1279_v33 = vmul.f32 %v3192_v29, %v2701_v27  ;;  %v3329_v19 = vld [vmem:[%s2680_s22 + $0x88] sm:$0x3] }
  0xa4   : > { %v1889_v34 = vadd.f32 %v2658_v13, %v1846_v59  ;;  %v1315_v35 = vrot.slane %v1278_v22, 2  ;;  %v1497_v23 = vmul.f32 %v3264_v39, %v2703_v28  ;;  %v1498_v24 = vmul.f32 %v3282_v49, %v2703_v28 }
  0xa5   : > { %v898_v37 = vadd.f32 %v878_v14, %v679_v1  ;;  %v1097_v38 = vsel %vm568_vm0, %v1095_v0, %v1096_v32  ;;  %v1316_v30 = vrot.slane %v1279_v33, 2  ;;  %v1716_v25 = vmul.f32 %v3270_v17, %v2786_v2 }
  0xa6   : > { %v1897_v26 = vmax.f32 %v1889_v34, 0.0  ;;  %v1534_v61 = vrot.slane %v1497_v23, 2  ;;  %v1535_v27 = vrot.slane %v1498_v24, 2  ;;  %v1717_v58 = vmul.f32 %v3289_v56, %v2786_v2 }
  0xa7   : > { %v1117_v43 = vadd.f32 %v1097_v38, %v898_v37  ;;  %v1317_v18 = vsel %vm1226_vm1, %v1315_v35, %v1316_v30  ;;  %v1753_v36 = vrot.slane %v1716_v25, 2  ;;  %v424_v28 = vmul.f32 %v3270_v17, %v2639_v4 }
  0xa8   : > { %1948 = vrot.lane.b32.xlu0 %v1897_v26, %s2560_s23  ;;  %v1536_v44 = vsel %vm1226_vm1, %v1534_v61, %v1535_v27  ;;  %v1754_v47 = vrot.slane %v1717_v58, 2  ;;  %v475_v50 = vmul.f32 %v3315_v20, %v2641_v5  ;;  %v526_v2 = vmul.f32 %v2643_v6, %v3052_v3 }
  0xa9   : > { %v1337_v51 = vadd.f32 %v1317_v18, %v1117_v43  ;;  %v697_v54 = vmul.f32 %v3270_v17, %v2645_v7  ;;  %v698_v21 = vmul.f32 %v3289_v56, %v2645_v7  ;;  %v916_v55 = vmul.f32 %v3315_v20, %v2647_v8 }
  0xaa   : > { %v1755_v63 = vsel %vm1226_vm1, %v1753_v36, %v1754_v47  ;;  %v483_v45 = vadd.f32 %v475_v50, %v424_v28  ;;  %v917_v57 = vmul.f32 %v3329_v19, %v2647_v8  ;;  %v1135_v59 = vmul.f32 %v2649_v9, %v3052_v3 }
  0xab   : > { %v1556_v60 = vadd.f32 %v1536_v44, %v1337_v51  ;;  %v736_v0 = vrot.slane %v697_v54, 1  ;;  %v737_v22 = vrot.slane %v698_v21, 1  ;;  %v955_v1 = vrot.slane %v916_v55, 1 }
  0xac   : > { %v534_v14 = vadd.f32 %v526_v2, %v483_v45  ;;  %v956_v32 = vrot.slane %v917_v57, 1  ;;  %v1136_v33 = vmul.f32 %v2649_v9, %v3062_v41  ;;  %v1174_v34 = vrot.slane %v1135_v59, 1 }
  0xad   : > { %v1775_v35 = vadd.f32 %v1755_v63, %v1556_v60  ;;  %v738_v23 = vsel %vm568_vm0, %v736_v0, %v737_v22  ;;  %v1355_v24 = vmul.f32 %v3270_v17, %v2651_v10  ;;  %v1356_v37 = vmul.f32 %v3289_v56, %v2651_v10 }
  0xae   : > { %v754_v38 = vadd.f32 %v738_v23, %v534_v14  ;;  %v957_v30 = vsel %vm568_vm0, %v955_v1, %v956_v32  ;;  %v1175_v25 = vrot.slane %v1136_v33, 1  ;;  %v1574_v26 = vmul.f32 %v3315_v20, %v2653_v11 }
  0xaf   : > { %v1874_v61 = vadd.f32 %v2663_v15, %v1775_v35  ;;  %v1394_v27 = vrot.slane %v1355_v24, 2  ;;  %v1395_v58 = vrot.slane %v1356_v37, 2  ;;  %v1575_v43 = vmul.f32 %v3329_v19, %v2653_v11 }
  0xb0   : > { %v973_v18 = vadd.f32 %v957_v30, %v754_v38  ;;  %v1176_v36 = vsel %vm568_vm0, %v1174_v34, %v1175_v25  ;;  %v1613_v28 = vrot.slane %v1574_v26, 2  ;;  %v1793_v44 = vmul.f32 %v2656_v12, %v3052_v3 }
  0xb1   : > { %v1882_v47 = vmax.f32 %v1874_v61, 0.0  ;;  %v1396_v50 = vsel %vm1226_vm1, %v1394_v27, %v1395_v58  ;;  %v1614_v2 = vrot.slane %v1575_v43, 2  ;;  %v1794_v15 = vmul.f32 %v2656_v12, %v3062_v41  ;;  %v3391_v61 = vld [vmem:[%s2680_s22 + $0x28] sm:$0x3] }
  0xb2   : > { %v1192_v51 = vadd.f32 %v1176_v36, %v973_v18  ;;  %v1832_v54 = vrot.slane %v1793_v44, 2  ;;  %v418_v21 = vmul.f32 %v2639_v4, %v2925_v16  ;;  %v469_v55 = vmul.f32 %v2641_v5, %v2868_v42  ;;  %v3367_v4 = vld [vmem:[%s2680_s22 + $0x20] sm:$0xff]  ;;  %v3402_v18 = vld [vmem:[%s2680_s22 + $0x38] sm:$0x3] }
  0xb3   : > { %1920 = vrot.lane.b32.xlu2 %v1882_v47, %s2561_s28  ;;  %v1615_v3 = vsel %vm1226_vm1, %v1613_v28, %v1614_v2  ;;  %v1833_v63 = vrot.slane %v1794_v15, 2  ;;  %v520_v45 = vmul.f32 %v2643_v6, %v2875_v48  ;;  %v685_v41 = vmul.f32 %v2645_v7, %v2925_v16  ;;  %v3375_v6 = vld [vmem:[%s2680_s22 + $0x30] sm:$0xff]  ;;  %s2563_s28 = smov 120  }
  0xb4   : > { %v1412_v57 = vadd.f32 %v1396_v50, %v1192_v51  ;;  %v477_v59 = vadd.f32 %v469_v55, %v418_v21  ;;  %v686_v60 = vmul.f32 %v2645_v7, %v2936_v40  ;;  %v904_v5 = vmul.f32 %v3367_v4, %v2647_v8  ;;  %v373_v50 = vld [vmem:[%s3935_s1 + $0x4] sm:$0x7] }
  0xb5   : > { %v1834_v42 = vsel %vm1226_vm1, %v1832_v54, %v1833_v63  ;;  %v718_v0 = vrot.slane %v685_v41, 1  ;;  %v905_v22 = vmul.f32 %v2647_v8, %v2882_v53  ;;  %v1123_v48 = vmul.f32 %v3375_v6, %v2649_v9  ;;  %v2525_v54 = vld [vmem:[%s3936_s2] sm:$0x7] }
  0xb6   : > { %v1631_v1 = vadd.f32 %v1615_v3, %v1412_v57  ;;  %v528_v14 = vadd.f32 %v520_v45, %v477_v59  ;;  %v719_v32 = vrot.slane %v686_v60, 1  ;;  %v937_v7 = vrot.slane %v904_v5, 1  ;;  %v1984_v63 = vld [vmem:[%s3937_s3] sm:$0xff] }
  0xb7   : > { %v938_v33 = vrot.slane %v905_v22, 1  ;;  %v1124_v34 = vmul.f32 %v2649_v9, %v2888_v62  ;;  %v1156_v35 = vrot.slane %v1123_v48, 1  ;;  %v1343_v23 = vmul.f32 %v2651_v10, %v2925_v16 }
  0xb8   : > { %v1850_v24 = vadd.f32 %v1834_v42, %v1631_v1  ;;  %v720_v8 = vsel %vm568_vm0, %v718_v0, %v719_v32  ;;  %v1344_v53 = vmul.f32 %v2651_v10, %v2936_v40  ;;  %v1562_v37 = vmul.f32 %v3367_v4, %v2653_v11  ;;  %v1985_v10 = vld [vmem:[%s3937_s3 + $0x8] sm:$0xf] }
  0xb9   : > { %v748_v38 = vadd.f32 %v720_v8, %v528_v14  ;;  %v939_v30 = vsel %vm568_vm0, %v937_v7, %v938_v33  ;;  %v1157_v25 = vrot.slane %v1124_v34, 1  ;;  %v1376_v26 = vrot.slane %v1343_v23, 2 }
  0xba   : > { %v1893_v9 = vadd.f32 %v2658_v13, %v1850_v24  ;;  %v1377_v62 = vrot.slane %v1344_v53, 2  ;;  %v1563_v16 = vmul.f32 %v3391_v61, %v2653_v11  ;;  %v1595_v27 = vrot.slane %v1562_v37, 2  ;;  %v372_v11 = vld [vmem:[%s3935_s1] sm:$0x7] }
  0xbb   : > { %v967_v40 = vadd.f32 %v939_v30, %v748_v38  ;;  %v1158_v58 = vsel %vm568_vm0, %v1156_v35, %v1157_v25  ;;  %v1781_v43 = vmul.f32 %v3375_v6, %v2656_v12  ;;  %v1782_v36 = vmul.f32 %v3402_v18, %v2656_v12  ;;  %v374_v12 = vld [vmem:[%s3935_s1 + $0x8] sm:$0x7] }
  0xbc   : > { %v1901_v28 = vmax.f32 %v1893_v9, 0.0  ;;  %v1378_v44 = vsel %vm1226_vm1, %v1376_v26, %v1377_v62  ;;  %v1596_v47 = vrot.slane %v1563_v16, 2  ;;  %vm2015_vm2 = vcmask 1043456  }
  0xbd   : > { %v1186_v2 = vadd.f32 %v1158_v58, %v967_v40  ;;  %v1814_v15 = vrot.slane %v1781_v43, 2  ;;  %v1815_v51 = vrot.slane %v1782_v36, 2  ;;  %2473 = vmatpush.msk.msra.mxu2 %vm2015_vm2, %v1985_v10  ;;  %2474 = vmatpush.msk.msra.mxu3 %vm2015_vm2, %v1985_v10  ;;  %v3421_v21 = vperm.slane %v2525_v54, 0 }
  0xbe   : > { %1956 = vrot.lane.b32.xlu2 %v1901_v28, %s2560_s23  ;;  %v1597_v55 = vsel %vm1226_vm1, %v1595_v27, %v1596_v47  ;;  %v3425_v3 = vperm.slane %v372_v11, 1  ;;  %2434 = vmatpush.msk.msra.mxu0 %vm2015_vm2, %v1985_v10  ;;  %v3431_v41 = vperm.slane %v373_v50, 0  ;;  %v3433_v57 = vperm.slane %v373_v50, 1 }
  0xbf   : > { %v1406_v45 = vadd.f32 %v1378_v44, %v1186_v2  ;;  %v3435_v59 = vperm.slane %v374_v12, 1  ;;  %2476 = vmatpush.msra.mxu2 %v1984_v63  ;;  %2477 = vmatpush.msra.mxu3 %v1984_v63  ;;  %v1816_v60 = vsel %vm1226_vm1, %v1814_v15, %v1815_v51  ;;  %v3438_v5 = vperm.slane %v374_v12, 0 }
  0xc0   : > { %v544_v42 = vmul.f32 %v3202_v31, %v3425_v3  ;;  %v545_v0 = vmul.f32 %v3209_v46, %v3425_v3  ;;  %2472 = vmatpush.msk.msra.mxu1 %vm2015_vm2, %v1985_v10  ;;  %v764_v48 = vmul.f32 %v3215_v52, %v3433_v57  ;;  %v765_v1 = vmul.f32 %v3192_v29, %v3433_v57 }
  0xc1   : > { %v1625_v22 = vadd.f32 %v1597_v55, %v1406_v45  ;;  %v983_v14 = vmul.f32 %v3264_v39, %v3435_v59  ;;  %2034 = vmatpush.msra.mxu0 %v1984_v63  ;;  %v984_v33 = vmul.f32 %v3282_v49, %v3435_v59  ;;  %v3453_v34 = vperm.slane %v372_v11, 2  ;;  %v3486_v55 = vld [vmem:[%s2680_s22 + $0x10] sm:$0xff] }
  0xc2   : > { %v581_v32 = vrot.slane %v544_v42, 1  ;;  %v582_v7 = vrot.slane %v545_v0, 1  ;;  %2475 = vmatpush.msra.mxu1 %v1984_v63  ;;  %v3455_v23 = vperm.slane %v372_v11, 0  ;;  %v800_v24 = vrot.slane %v764_v48, 1  ;;  %v2527_v42 = vld [vmem:[%s2680_s22] sm:$0xff] }
  0xc3   : > { %v1844_v35 = vadd.f32 %v1816_v60, %v1625_v22  ;;  %v801_v8 = vrot.slane %v765_v1, 1  ;;  %v1019_v53 = vrot.slane %v983_v14, 1  ;;  %v1020_v37 = vrot.slane %v984_v33, 1  ;;  %v2528_v22 = vld [vmem:[%s2680_s22 + $0x8] sm:$0x3] }
  0xc4   : > { %v1202_v38 = vmul.f32 %v3202_v31, %v3453_v34  ;;  %v1203_v30 = vmul.f32 %v3209_v46, %v3453_v34  ;;  %v438_v26 = vmul.f32 %v3215_v52, %v3431_v41  ;;  %v3464_v9 = vperm.slane %v373_v50, 2 }
  0xc5   : > { %v1887_v25 = vadd.f32 %v2658_v13, %v1844_v35  ;;  %v3466_v62 = vperm.slane %v374_v12, 2  ;;  %v489_v16 = vmul.f32 %v3264_v39, %v3438_v5  ;;  %v583_v27 = vsel %vm568_vm0, %v581_v32, %v582_v7  ;;  %v3501_v7 = vld [vmem:[%s2680_s22 + $0x18] sm:$0x3] }
  0xc6   : > { %v1239_v10 = vrot.slane %v1202_v38, 2  ;;  %v1240_v40 = vrot.slane %v1203_v30, 2  ;;  %v1422_v43 = vmul.f32 %v3215_v52, %v3464_v9  ;;  %v1423_v13 = vmul.f32 %v3192_v29, %v3464_v9 }
  0xc7   : > { %v1895_v58 = vmax.f32 %v1887_v25, 0.0  ;;  %v1641_v36 = vmul.f32 %v3264_v39, %v3466_v62  ;;  %v802_v11 = vsel %vm568_vm0, %v800_v24, %v801_v8  ;;  %v1021_v28 = vsel %vm568_vm0, %v1019_v53, %v1020_v37 }
  0xc8   : > { %v1642_v44 = vmul.f32 %v3282_v49, %v3466_v62  ;;  %v387_v47 = vmul.f32 %v3202_v31, %v3455_v23  ;;  %v1241_v50 = vsel %vm1226_vm1, %v1239_v10, %v1240_v40  ;;  %v1458_v2 = vrot.slane %v1422_v43, 2 }
  0xc9   : > { %1944 = vrot.lane.b32.xlu2 %v1895_v58, %s2560_s23  ;;  %v1459_v15 = vrot.slane %v1423_v13, 2  ;;  %v1677_v51 = vrot.slane %v1641_v36, 2  ;;  %v434_v63 = vmul.f32 %v3486_v55, %v3431_v41  ;;  %v485_v45 = vmul.f32 %v3367_v4, %v3438_v5  ;;  %s3775_s23 = scalar_lea.vmem %s3939_s5, %s3766_s18 }
  0xca   : > { %v1678_v12 = vrot.slane %v1642_v44, 2  ;;  %v446_v54 = vadd.f32 %v438_v26, %v387_v47  ;;  %v536_v0 = vmul.f32 %v2527_v42, %v3425_v3  ;;  %v537_v48 = vmul.f32 %v2528_v22, %v3425_v3 }
  0xcb   : > { %v1460_v60 = vsel %vm1226_vm1, %v1458_v2, %v1459_v15  ;;  %v756_v1 = vmul.f32 %v3486_v55, %v3433_v57  ;;  %v757_v33 = vmul.f32 %v3501_v7, %v3433_v57  ;;  %v975_v35 = vmul.f32 %v3367_v4, %v3435_v59 }
  0xcc   : > { %v1679_v14 = vsel %vm1226_vm1, %v1677_v51, %v1678_v12  ;;  %v497_v32 = vadd.f32 %v489_v16, %v446_v54  ;;  %v569_v24 = vrot.slane %v536_v0, 1  ;;  %v570_v8 = vrot.slane %v537_v48, 1 }
  0xcd   : > { %v788_v53 = vrot.slane %v756_v1, 1  ;;  %v976_v37 = vmul.f32 %v3391_v61, %v3435_v59  ;;  %v789_v30 = vrot.slane %v757_v33, 1  ;;  %v1007_v25 = vrot.slane %v975_v35, 1 }
  0xce   : > { %v605_v38 = vadd.f32 %v583_v27, %v497_v32  ;;  %v1194_v26 = vmul.f32 %v2527_v42, %v3453_v34  ;;  %v571_v16 = vsel %vm568_vm0, %v569_v24, %v570_v8  ;;  %v1195_v40 = vmul.f32 %v2528_v22, %v3453_v34  ;;  %v1919_v24 = vpop.permute.xlu0 %1918 }
  0xcf   : > { %v1008_v10 = vrot.slane %v976_v37, 1  ;;  %v1414_v58 = vmul.f32 %v3486_v55, %v3464_v9  ;;  %v790_v13 = vsel %vm568_vm0, %v788_v53, %v789_v30  ;;  %v1415_v44 = vmul.f32 %v3501_v7, %v3464_v9 }
  0xd0   : > { %v824_v43 = vadd.f32 %v802_v11, %v605_v38  ;;  %v1227_v36 = vrot.slane %v1194_v26, 2  ;;  %v1228_v47 = vrot.slane %v1195_v40, 2  ;;  %v1633_v15 = vmul.f32 %v3367_v4, %v3466_v62 }
  0xd1   : > { %v1009_v27 = vsel %vm568_vm0, %v1007_v25, %v1008_v10  ;;  %v1446_v2 = vrot.slane %v1414_v58, 2  ;;  %v1447_v12 = vrot.slane %v1415_v44, 2  ;;  %v1634_v54 = vmul.f32 %v3391_v61, %v3466_v62 }
  0xd2   : > { %v1043_v51 = vadd.f32 %v1021_v28, %v824_v43  ;;  %v383_v11 = vmul.f32 %v2527_v42, %v3455_v23  ;;  %vm1966_vm3 = vcmask 31744   ;;  %v1229_v0 = vsel %vm1226_vm1, %v1227_v36, %v1228_v47 }
  0xd3   : > { %v1665_v22 = vrot.slane %v1633_v15, 2  ;;  %v389_v48 = vmul.f32 %v3264_v39, %v3455_v23  ;;  %v440_v1 = vmul.f32 %v3270_v17, %v3431_v41  ;;  %vm1975_vm4 = vcmask 64512  }
  0xd4   : > { %v1263_v32 = vadd.f32 %v1241_v50, %v1043_v51  ;;  %v1448_v28 = vsel %vm1226_vm1, %v1446_v2, %v1447_v12  ;;  %v1666_v33 = vrot.slane %v1634_v54, 2  ;;  %v442_v35 = vadd.f32 %v434_v63, %v383_v11 }
  0xd5   : > { %vm1990_vm5 = vcmask 97280   ;;  %v448_v8 = vadd.f32 %v440_v1, %v389_v48  ;;  %v491_v42 = vmul.f32 %v3315_v20, %v3438_v5  ;;  %v548_v53 = vmul.f32 %v3264_v39, %v3425_v3  ;;  %v1951_v48 = vpop.permute.xlu1 %1950 }
  0xd6   : > { %v549_v37 = vmul.f32 %v3282_v49, %v3425_v3  ;;  %v1482_v38 = vadd.f32 %v1460_v60, %v1263_v32  ;;  %v1667_v50 = vsel %vm1226_vm1, %v1665_v22, %v1666_v33  ;;  %v493_v30 = vadd.f32 %v485_v45, %v442_v35 }
  0xd7   : > { %v768_v25 = vmul.f32 %v3270_v17, %v3433_v57  ;;  %v499_v63 = vadd.f32 %v491_v42, %v448_v8  ;;  %v587_v26 = vrot.slane %v548_v53, 1  ;;  %v769_v40 = vmul.f32 %v3289_v56, %v3433_v57 }
  0xd8   : > { %v588_v10 = vrot.slane %v549_v37, 1  ;;  %v1701_v58 = vadd.f32 %v1679_v14, %v1482_v38  ;;  %v601_v43 = vadd.f32 %v571_v16, %v493_v30  ;;  %v987_v44 = vmul.f32 %v3315_v20, %v3435_v59 }
  0xd9   : > { %v806_v36 = vrot.slane %v768_v25, 1  ;;  %v807_v47 = vrot.slane %v769_v40, 1  ;;  %v988_v45 = vmul.f32 %v3329_v19, %v3435_v59  ;;  %v1206_v2 = vmul.f32 %v3264_v39, %v3453_v34  ;;  %v1923_v40 = vpop.permute.xlu0 %1922 }
  0xda   : > { %v589_v60 = vsel %vm568_vm0, %v587_v26, %v588_v10  ;;  %v1856_v15 = vadd.f32 %v3421_v21, %v1701_v58  ;;  %v820_v51 = vadd.f32 %v790_v13, %v601_v43  ;;  %v1025_v54 = vrot.slane %v987_v44, 1 }
  0xdb   : > { %v607_v12 = vadd.f32 %v589_v60, %v499_v63  ;;  %v808_v14 = vsel %vm568_vm0, %v806_v36, %v807_v47  ;;  %v1026_v16 = vrot.slane %v988_v45, 1  ;;  %v1207_v11 = vmul.f32 %v3282_v49, %v3453_v34 }
  0xdc   : > { %v1245_v22 = vrot.slane %v1206_v2, 2  ;;  %v1864_v1 = vmax.f32 %v1856_v15, 0.0  ;;  %v1039_v32 = vadd.f32 %v1009_v27, %v820_v51  ;;  %v1426_v35 = vmul.f32 %v3270_v17, %v3464_v9 }
  0xdd   : > { %v826_v33 = vadd.f32 %v808_v14, %v607_v12  ;;  %v1027_v8 = vsel %vm568_vm0, %v1025_v54, %v1026_v16  ;;  %v1246_v42 = vrot.slane %v1207_v11, 2  ;;  %v1427_v13 = vmul.f32 %v3289_v56, %v3464_v9 }
  0xde   : > { %v1645_v53 = vmul.f32 %v3315_v20, %v3466_v62  ;;  %v1971_v37 = vsel %vm1966_vm3, %v1864_v1, %v1919_v24  ;;  %v1259_v38 = vadd.f32 %v1229_v0, %v1039_v32  ;;  %v1464_v25 = vrot.slane %v1426_v35, 2 }
  0xdf   : > { %v1045_v30 = vadd.f32 %v1027_v8, %v826_v33  ;;  %v1980_v27 = vsel %vm1975_vm4, %v1971_v37, %v1951_v48  ;;  %v1247_v63 = vsel %vm1226_vm1, %v1245_v22, %v1246_v42  ;;  %v1465_v26 = vrot.slane %v1427_v13, 2 }
  0xe0   : > { %v1646_v10 = vmul.f32 %v3329_v19, %v3466_v62  ;;  %2439 = vmatmul.msk.f32.vlgmr.msra.gmra.mxu2 %vm1990_vm5, %v1980_v27  ;;  %v1478_v58 = vadd.f32 %v1448_v28, %v1259_v38  ;;  %v1683_v36 = vrot.slane %v1645_v53, 2  ;;  %v385_v24 = vmul.f32 %v3367_v4, %v3455_v23  ;;  %v1911_v53 = vpop.permute.xlu2 %1910 }
  0xe1   : > { %v1265_v43 = vadd.f32 %v1247_v63, %v1045_v30  ;;  %v1466_v0 = vsel %vm1226_vm1, %v1464_v25, %v1465_v26  ;;  %v436_v60 = vmul.f32 %v3375_v6, %v3431_v41  ;;  %v487_v47 = vmul.f32 %v3202_v31, %v3438_v5  ;;  %v1955_v63 = vpop.permute.xlu1 %1954 }
  0xe2   : > { %v1684_v44 = vrot.slane %v1646_v10, 2  ;;  %v1697_v45 = vadd.f32 %v1667_v50, %v1478_v58  ;;  %v540_v15 = vmul.f32 %v3367_v4, %v3425_v3  ;;  %v541_v28 = vmul.f32 %v3391_v61, %v3425_v3 }
  0xe3   : > { %v1484_v2 = vadd.f32 %v1466_v0, %v1265_v43  ;;  %v444_v12 = vadd.f32 %v436_v60, %v385_v24  ;;  %v760_v54 = vmul.f32 %v3375_v6, %v3433_v57  ;;  %v761_v14 = vmul.f32 %v3402_v18, %v3433_v57 }
  0xe4   : > { %v1685_v51 = vsel %vm1226_vm1, %v1683_v36, %v1684_v44  ;;  %v1852_v16 = vadd.f32 %v3421_v21, %v1697_v45  ;;  %v575_v50 = vrot.slane %v540_v15, 1  ;;  %v576_v22 = vrot.slane %v541_v28, 1  ;;  %v1943_v44 = vpop.permute.xlu0 %1942 }
  0xe5   : > { %v1703_v11 = vadd.f32 %v1685_v51, %v1484_v2  ;;  %v495_v48 = vadd.f32 %v487_v47, %v444_v12  ;;  %v794_v1 = vrot.slane %v760_v54, 1  ;;  %v795_v32 = vrot.slane %v761_v14, 1 }
  0xe6   : > { %v979_v33 = vmul.f32 %v3202_v31, %v3435_v59  ;;  %v1860_v35 = vmax.f32 %v1852_v16, 0.0  ;;  %v577_v42 = vsel %vm568_vm0, %v575_v50, %v576_v22  ;;  %v980_v13 = vmul.f32 %v3209_v46, %v3435_v59 }
  0xe7   : > { %v1858_v8 = vadd.f32 %v3421_v21, %v1703_v11  ;;  %v603_v37 = vadd.f32 %v577_v42, %v495_v48  ;;  %v796_v38 = vsel %vm568_vm0, %v794_v1, %v795_v32  ;;  %v1198_v25 = vmul.f32 %v3367_v4, %v3453_v34  ;;  %v2530_v1 = vld [vmem:[%s2680_s22 + $0x90] sm:$0xff] }
  0xe8   : > { %v1013_v30 = vrot.slane %v979_v33, 1  ;;  %v1967_v27 = vsel %vm1966_vm3, %v1860_v35, %v1911_v53  ;;  %v1014_v10 = vrot.slane %v980_v13, 1  ;;  %v1199_v58 = vmul.f32 %v3391_v61, %v3453_v34 }
  0xe9   : > { %v1866_v26 = vmax.f32 %v1858_v8, 0.0  ;;  %v822_v43 = vadd.f32 %v796_v38, %v603_v37  ;;  %v1233_v36 = vrot.slane %v1198_v25, 2  ;;  %v1418_v24 = vmul.f32 %v3375_v6, %v3464_v9 }
  0xea   : > { %v1419_v0 = vmul.f32 %v3402_v18, %v3464_v9  ;;  %v1015_v47 = vsel %vm568_vm0, %v1013_v30, %v1014_v10  ;;  %v1234_v45 = vrot.slane %v1199_v58, 2  ;;  %v1637_v2 = vmul.f32 %v3202_v31, %v3466_v62  ;;  %v2531_v58 = vld [vmem:[%s2680_s22 + $0x98] sm:$0x3] }
  0xeb   : > { %v1973_v60 = vsel %vm1966_vm3, %v1866_v26, %v1923_v40  ;;  %v1041_v28 = vadd.f32 %v1015_v47, %v822_v43  ;;  %v1452_v51 = vrot.slane %v1418_v24, 2  ;;  %v1638_v14 = vmul.f32 %v3209_v46, %v3466_v62 }
  0xec   : > { %v1982_v15 = vsel %vm1975_vm4, %v1973_v60, %v1955_v63  ;;  %v1453_v12 = vrot.slane %v1419_v0, 2  ;;  %v1235_v54 = vsel %vm1226_vm1, %v1233_v36, %v1234_v45  ;;  %v1671_v40 = vrot.slane %v1637_v2, 2  ;;  %v1915_v45 = vpop.permute.xlu2 %1914 }
  0xed   : > { %2441 = vmatmul.msk.f32.vlgmr.msra.gmra.mxu3 %vm1990_vm5, %v1982_v15  ;;  %v1976_v16 = vsel %vm1975_vm4, %v1967_v27, %v1943_v44  ;;  %v1261_v11 = vadd.f32 %v1235_v54, %v1041_v28  ;;  %v390_v31 = vmul.f32 %v3270_v17, %v3455_v23  ;;  %v441_v22 = vmul.f32 %v3315_v20, %v3431_v41  ;;  %v1947_v54 = vpop.permute.xlu1 %1946 }
  0xee   : > { %v1454_v50 = vsel %vm1226_vm1, %v1452_v51, %v1453_v12  ;;  %2435 = vmatmul.msk.f32.vlgmr.msra.gmra.mxu0 %vm1990_vm5, %v1976_v16  ;;  %v1672_v48 = vrot.slane %v1638_v14, 2  ;;  %v492_v32 = vmul.f32 %v2530_v1, %v3438_v5  ;;  %v550_v46 = vmul.f32 %v3270_v17, %v3425_v3 }
  0xef   : > { %v551_v33 = vmul.f32 %v3289_v56, %v3425_v3  ;;  %v1480_v35 = vadd.f32 %v1454_v50, %v1261_v11  ;;  %v449_v8 = vadd.f32 %v441_v22, %v390_v31  ;;  %v770_v42 = vmul.f32 %v3315_v20, %v3433_v57 }
  0xf0   : > { %v771_v13 = vmul.f32 %v3329_v19, %v3433_v57  ;;  %v1673_v53 = vsel %vm1226_vm1, %v1671_v40, %v1672_v48  ;;  %v590_v37 = vrot.slane %v550_v46, 1  ;;  %v989_v30 = vmul.f32 %v2530_v1, %v3435_v59 }
  0xf1   : > { %v591_v38 = vrot.slane %v551_v33, 1  ;;  %v1699_v25 = vadd.f32 %v1673_v53, %v1480_v35  ;;  %v500_v27 = vadd.f32 %v492_v32, %v449_v8  ;;  %v809_v63 = vrot.slane %v770_v42, 1 }
  0xf2   : > { %v810_v26 = vrot.slane %v771_v13, 1  ;;  %v990_v43 = vmul.f32 %v2531_v58, %v3435_v59  ;;  %v1028_v36 = vrot.slane %v989_v30, 1  ;;  %v1208_v24 = vmul.f32 %v3270_v17, %v3453_v34 }
  0xf3   : > { %v592_v10 = vsel %vm568_vm0, %v590_v37, %v591_v38  ;;  %v1854_v0 = vadd.f32 %v3421_v21, %v1699_v25  ;;  %v1209_v47 = vmul.f32 %v3289_v56, %v3453_v34  ;;  %v1428_v28 = vmul.f32 %v3315_v20, %v3464_v9 }
  0xf4   : > { %v608_v44 = vadd.f32 %v592_v10, %v500_v27  ;;  %v811_v60 = vsel %vm568_vm0, %v809_v63, %v810_v26  ;;  %v1029_v2 = vrot.slane %v990_v43, 1  ;;  %v1248_v15 = vrot.slane %v1208_v24, 2 }
  0xf5   : > { %v1429_v51 = vmul.f32 %v3329_v19, %v3464_v9  ;;  %v1862_v12 = vmax.f32 %v1854_v0, 0.0  ;;  %v1249_v40 = vrot.slane %v1209_v47, 2  ;;  %v1647_v16 = vmul.f32 %v2530_v1, %v3466_v62 }
  0xf6   : > { %v827_v14 = vadd.f32 %v811_v60, %v608_v44  ;;  %v1030_v11 = vsel %vm568_vm0, %v1028_v36, %v1029_v2  ;;  %v1467_v50 = vrot.slane %v1428_v28, 2  ;;  %v1648_v22 = vmul.f32 %v2531_v58, %v3466_v62 }
  0xf7   : > { %v1468_v31 = vrot.slane %v1429_v51, 2  ;;  %v1969_v48 = vsel %vm1966_vm3, %v1862_v12, %v1915_v45  ;;  %v1250_v20 = vsel %vm1226_vm1, %v1248_v15, %v1249_v40  ;;  %v1686_v46 = vrot.slane %v1647_v16, 2 }
  0xf8   : > { %v1046_v32 = vadd.f32 %v1030_v11, %v827_v14  ;;  %v1978_v19 = vsel %vm1975_vm4, %v1969_v48, %v1947_v54  ;;  %v1687_v35 = vrot.slane %v1648_v22, 2  ;;  %v388_v1 = vmul.f32 %v3215_v52, %v3455_v23 }
  0xf9   : > { %v1469_v33 = vsel %vm1226_vm1, %v1467_v50, %v1468_v31  ;;  %2437 = vmatmul.msk.f32.vlgmr.msra.gmra.mxu1 %vm1990_vm5, %v1978_v19  ;;  %v439_v42 = vmul.f32 %v3264_v39, %v3431_v41  ;;  %v490_v13 = vmul.f32 %v3270_v17, %v3438_v5  ;;  %v546_v53 = vmul.f32 %v3215_v52, %v3425_v3 }
  0xfa   : > { %v1266_v8 = vadd.f32 %v1250_v20, %v1046_v32  ;;  %v1688_v37 = vsel %vm1226_vm1, %v1686_v46, %v1687_v35  ;;  %v547_v38 = vmul.f32 %v3192_v29, %v3425_v3  ;;  %v766_v30 = vmul.f32 %v3264_v39, %v3433_v57 }
  0xfb   : > { %v767_v25 = vmul.f32 %v3282_v49, %v3433_v57  ;;  %v447_v63 = vadd.f32 %v439_v42, %v388_v1  ;;  %v584_v26 = vrot.slane %v546_v53, 1  ;;  %v985_v10 = vmul.f32 %v3270_v17, %v3435_v59 }
  0xfc   : > { %v1485_v27 = vadd.f32 %v1469_v33, %v1266_v8  ;;  %v585_v58 = vrot.slane %v547_v38, 1  ;;  %v803_v43 = vrot.slane %v766_v30, 1  ;;  %v986_v24 = vmul.f32 %v3289_v56, %v3435_v59 }
  0xfd   : > { %v804_v36 = vrot.slane %v767_v25, 1  ;;  %v498_v44 = vadd.f32 %v490_v13, %v447_v63  ;;  %v1022_v60 = vrot.slane %v985_v10, 1  ;;  %v1204_v47 = vmul.f32 %v3215_v52, %v3453_v34 }
  0xfe   : > { %v1704_v0 = vadd.f32 %v1688_v37, %v1485_v27  ;;  %v586_v45 = vsel %vm568_vm0, %v584_v26, %v585_v58  ;;  %v1023_v15 = vrot.slane %v986_v24, 1  ;;  %v1205_v28 = vmul.f32 %v3192_v29, %v3453_v34 }
  0xff   : > { %v805_v2 = vsel %vm568_vm0, %v803_v43, %v804_v36  ;;  %v606_v12 = vadd.f32 %v586_v45, %v498_v44  ;;  %v1242_v54 = vrot.slane %v1204_v47, 2  ;;  %v1424_v14 = vmul.f32 %v3264_v39, %v3464_v9 }
 0x100   : > { %v1859_v51 = vadd.f32 %v3421_v21, %v1704_v0  ;;  %v1024_v40 = vsel %vm568_vm0, %v1022_v60, %v1023_v15  ;;  %v1243_v16 = vrot.slane %v1205_v28, 2  ;;  %v1425_v52 = vmul.f32 %v3282_v49, %v3464_v9 }
 0x101   : > { %v1643_v11 = vmul.f32 %v3270_v17, %v3466_v62  ;;  %v825_v50 = vadd.f32 %v805_v2, %v606_v12  ;;  %v1461_v31 = vrot.slane %v1424_v14, 2  ;;  %v1644_v29 = vmul.f32 %v3289_v56, %v3466_v62 }
 0x102   : > { %v1244_v22 = vsel %vm1226_vm1, %v1242_v54, %v1243_v16  ;;  %v1462_v48 = vrot.slane %v1425_v52, 2  ;;  %v384_v39 = vmul.f32 %v3486_v55, %v3455_v23  ;;  %v1867_v20 = vmax.f32 %v1859_v51, 0.0  ;;  %v1925_v54 = vpop.permute.xlu0 %1924 }
 0x103   : > { %v1680_v32 = vrot.slane %v1643_v11, 2  ;;  %v1044_v46 = vadd.f32 %v1024_v40, %v825_v50  ;;  %v1681_v19 = vrot.slane %v1644_v29, 2  ;;  %v435_v49 = vmul.f32 %v3367_v4, %v3431_v41 }
 0x104   : > { %v1463_v17 = vsel %vm1226_vm1, %v1461_v31, %v1462_v48  ;;  %v486_v33 = vmul.f32 %v3375_v6, %v3438_v5  ;;  %v538_v56 = vmul.f32 %v3486_v55, %v3425_v3  ;;  %v539_v35 = vmul.f32 %v3501_v7, %v3425_v3  ;;  %v2532_v48 = vld [vmem:[%s2680_s22 + $0x40] sm:$0xff] }
 0x105   : > { %v1264_v1 = vadd.f32 %v1244_v22, %v1044_v46  ;;  %v1682_v8 = vsel %vm1226_vm1, %v1680_v32, %v1681_v19  ;;  %v443_v42 = vadd.f32 %v435_v49, %v384_v39  ;;  %v758_v13 = vmul.f32 %v3367_v4, %v3433_v57  ;;  %v2533_v19 = vld [vmem:[%s2680_s22 + $0x50] sm:$0xff] }
 0x106   : > { %v572_v53 = vrot.slane %v538_v56, 1  ;;  %v573_v37 = vrot.slane %v539_v35, 1  ;;  %v759_v38 = vmul.f32 %v3391_v61, %v3433_v57  ;;  %v977_v30 = vmul.f32 %v3375_v6, %v3435_v59 }
 0x107   : > { %v1483_v25 = vadd.f32 %v1463_v17, %v1264_v1  ;;  %v494_v27 = vadd.f32 %v486_v33, %v443_v42  ;;  %v791_v63 = vrot.slane %v758_v13, 1  ;;  %v978_v26 = vmul.f32 %v3402_v18, %v3435_v59 }
 0x108   : > { %v574_v10 = vsel %vm568_vm0, %v572_v53, %v573_v37  ;;  %v792_v58 = vrot.slane %v759_v38, 1  ;;  %v1010_v43 = vrot.slane %v977_v30, 1  ;;  %v1196_v36 = vmul.f32 %v3486_v55, %v3453_v34  ;;  %v2535_v37 = vld [vmem:[%s2680_s22 + $0x58] sm:$0x3] }
 0x109   : > { %v1702_v24 = vadd.f32 %v1682_v8, %v1483_v25  ;;  %v602_v0 = vadd.f32 %v574_v10, %v494_v27  ;;  %v1011_v44 = vrot.slane %v978_v26, 1  ;;  %v1197_v60 = vmul.f32 %v3501_v7, %v3453_v34 }
 0x10a   : > { %v793_v47 = vsel %vm568_vm0, %v791_v63, %v792_v58  ;;  %v1230_v45 = vrot.slane %v1196_v36, 2  ;;  %v1416_v2 = vmul.f32 %v3367_v4, %v3464_v9  ;;  %v1417_v15 = vmul.f32 %v3391_v61, %v3464_v9 }
 0x10b   : > { %v1857_v28 = vadd.f32 %v3421_v21, %v1702_v24  ;;  %v821_v51 = vadd.f32 %v793_v47, %v602_v0  ;;  %v1012_v55 = vsel %vm568_vm0, %v1010_v43, %v1011_v44  ;;  %v1231_v12 = vrot.slane %v1197_v60, 2 }
 0x10c   : > { %v1449_v14 = vrot.slane %v1416_v2, 2  ;;  %v1450_v7 = vrot.slane %v1417_v15, 2  ;;  %v1635_v40 = vmul.f32 %v3375_v6, %v3466_v62  ;;  %v1636_v4 = vmul.f32 %v3402_v18, %v3466_v62 }
 0x10d   : > { %v1974_v16 = vsel %vm1966_vm3, %v1867_v20, %v1925_v54  ;;  %v1040_v61 = vadd.f32 %v1012_v55, %v821_v51  ;;  %v1232_v52 = vsel %vm1226_vm1, %v1230_v45, %v1231_v12  ;;  %v386_v11 = vmul.f32 %v3375_v6, %v3455_v23  ;;  %v1921_v50 = vpop.permute.xlu2 %1920  ;;  %v1913_v55 = vpop.permute.xlu0 %1912 }
 0x10e   : > { %v1451_v31 = vsel %vm1226_vm1, %v1449_v14, %v1450_v7  ;;  %v1668_v29 = vrot.slane %v1635_v40, 2  ;;  %v1669_v22 = vrot.slane %v1636_v4, 2  ;;  %v437_v32 = vmul.f32 %v2532_v48, %v3431_v41  ;;  %v2534_v41 = vld [vmem:[%s2680_s22 + $0x48] sm:$0x3] }
 0x10f   : > { %v1865_v39 = vmax.f32 %v1857_v28, 0.0  ;;  %v1260_v46 = vadd.f32 %v1232_v52, %v1040_v61  ;;  %v488_v20 = vmul.f32 %v2533_v19, %v3438_v5  ;;  %v542_v49 = vmul.f32 %v3375_v6, %v3425_v3 }
 0x110   : > { %v1670_v23 = vsel %vm1226_vm1, %v1668_v29, %v1669_v22  ;;  %v445_v17 = vadd.f32 %v437_v32, %v386_v11  ;;  %v543_v33 = vmul.f32 %v3402_v18, %v3425_v3  ;;  %v762_v56 = vmul.f32 %v2532_v48, %v3433_v57 }
 0x111   : > { %v1479_v35 = vadd.f32 %v1451_v31, %v1260_v46  ;;  %v578_v1 = vrot.slane %v542_v49, 1  ;;  %v763_v8 = vmul.f32 %v2534_v41, %v3433_v57  ;;  %v981_v42 = vmul.f32 %v2533_v19, %v3435_v59 }
 0x112   : > { %v496_v13 = vadd.f32 %v488_v20, %v445_v17  ;;  %v579_v5 = vrot.slane %v543_v33, 1  ;;  %v797_v53 = vrot.slane %v762_v56, 1  ;;  %v982_v38 = vmul.f32 %v2535_v37, %v3435_v59 }
 0x113   : > { %v1972_v30 = vsel %vm1966_vm3, %v1865_v39, %v1921_v50  ;;  %v798_v25 = vrot.slane %v763_v8, 1  ;;  %v1016_v27 = vrot.slane %v981_v42, 1  ;;  %v1200_v3 = vmul.f32 %v3375_v6, %v3453_v34  ;;  %v1953_v6 = vpop.permute.xlu1 %1952 }
 0x114   : > { %v580_v63 = vsel %vm568_vm0, %v578_v1, %v579_v5  ;;  %v1017_v26 = vrot.slane %v982_v38, 1  ;;  %v1201_v57 = vmul.f32 %v3402_v18, %v3453_v34  ;;  %v1420_v10 = vmul.f32 %v2532_v48, %v3464_v9 }
 0x115   : > { %v1698_v58 = vadd.f32 %v1670_v23, %v1479_v35  ;;  %v604_v43 = vadd.f32 %v580_v63, %v496_v13  ;;  %v799_v36 = vsel %vm568_vm0, %v797_v53, %v798_v25  ;;  %v1236_v59 = vrot.slane %v1200_v3, 2 }
 0x116   : > { %v1018_v24 = vsel %vm568_vm0, %v1016_v27, %v1017_v26  ;;  %v1237_v0 = vrot.slane %v1201_v57, 2  ;;  %v1421_v44 = vmul.f32 %v2534_v41, %v3464_v9  ;;  %v1455_v60 = vrot.slane %v1420_v10, 2 }
 0x117   : > { %v823_v47 = vadd.f32 %v799_v36, %v604_v43  ;;  %v1639_v45 = vmul.f32 %v2533_v19, %v3466_v62  ;;  %v1640_v2 = vmul.f32 %v2535_v37, %v3466_v62  ;;  %v1981_v28 = vsel %vm1975_vm4, %v1972_v30, %v1953_v6 }
 0x118   : > { %v1957_v18 = vpop.permute.xlu2 %1956  ;;  %v1238_v34 = vsel %vm1226_vm1, %v1236_v59, %v1237_v0  ;;  %v1456_v15 = vrot.slane %v1421_v44, 2  ;;  %v1853_v51 = vadd.f32 %v3421_v21, %v1698_v58  ;;  %2440 = vmatmul.msk.f32.gmra.mxu2 %vm1990_vm5, %v1981_v28 }
 0x119   : > { %v1983_v12 = vsel %vm1975_vm4, %v1974_v16, %v1957_v18  ;;  %v1042_v54 = vadd.f32 %v1018_v24, %v823_v47  ;;  %v1674_v9 = vrot.slane %v1639_v45, 2  ;;  %v1675_v62 = vrot.slane %v1640_v2, 2 }
 0x11a   : > { %2442 = vmatmul.msk.f32.gmra.mxu3 %vm1990_vm5, %v1983_v12  ;;  %v1457_v14 = vsel %vm1226_vm1, %v1455_v60, %v1456_v15  ;;  %v1861_v4 = vmax.f32 %v1853_v51, 0.0  ;;  %v1949_v29 = vpop.permute.xlu0 %1948 }
 0x11b   : > { %v1262_v7 = vadd.f32 %v1238_v34, %v1042_v54  ;;  %v1676_v40 = vsel %vm1226_vm1, %v1674_v9, %v1675_v62  ;;  %v1917_v50 = vpop.permute.xlu1 %1916 }
 0x11c   : > { %v1968_v11 = vsel %vm1966_vm3, %v1861_v4, %v1913_v55 }
 0x11d   : > { %v1481_v61 = vadd.f32 %v1457_v14, %v1262_v7 }
 0x11f   : > { %v1700_v52 = vadd.f32 %v1676_v40, %v1481_v61 }
 0x121   : > { %v1855_v16 = vadd.f32 %v3421_v21, %v1700_v52  ;;  %v2510_v21 = vld [vmem:[%s3938_s4] ss:$0 sm:$0xff] }
 0x123   : > { %v1863_v31 = vmax.f32 %v1855_v16, 0.0  ;;  %v1945_v22 = vpop.permute.xlu2 %1944 }
 0x124   : > { %v1977_v48 = vsel %vm1975_vm4, %v1968_v11, %v1945_v22 }
 0x125   : > { %v1970_v32 = vsel %vm1966_vm3, %v1863_v31, %v1917_v50  ;;  %2436 = vmatmul.msk.f32.gmra.mxu0 %vm1990_vm5, %v1977_v48 }
 0x126   : > { %v1979_v39 = vsel %vm1975_vm4, %v1970_v32, %v1949_v29 }
 0x127   : > { %2438 = vmatmul.msk.f32.gmra.mxu1 %vm1990_vm5, %v1979_v39 }
 0x163   : > { %v2048_v46 = vpop.f32.mrf.mxu2 }
 0x164   : > { %v2049_v19 = vadd.f32 %v2510_v21, %v2048_v46 }
 0x166   : > { %2064 = vst.msk [vmem:[%s3775_s23 + $0x20] sm:$0xff] %vm1966_vm3, %v2049_v19 }
 0x16b   : > { %v2036_v20 = vpop.f32.mrf.mxu0 }
 0x16c   : > { %v2037_v49 = vadd.f32 %v2510_v21, %v2036_v20 }
 0x16e   : > { %2060 = vst.msk [vmem:[%s3775_s23] sm:$0xff] %vm1966_vm3, %v2037_v49  ;;  %2076 = vrot.lane.b32.xlu1 %v2037_v49, %s2562_s24 }
 0x170   : > { %v2054_v23 = vpop.f32.mrf.mxu3 }
 0x171   : > { %v2055_v17 = vadd.f32 %v2510_v21, %v2054_v23 }
 0x173   : > { %2066 = vst.msk [vmem:[%s3775_s23 + $0x30] sm:$0xff] %vm1966_vm3, %v2055_v17 }
 0x176   : > { %v2042_v33 = vpop.f32.mrf.mxu1 }
 0x177   : > { %v2043_v56 = vadd.f32 %v2510_v21, %v2042_v33 }
 0x179   : > { %2062 = vst.msk [vmem:[%s3775_s23 + $0x10] sm:$0xff] %vm1966_vm3, %v2043_v56  ;;  %2113 = vrot.lane.b32.xlu2 %v2043_v56, %s2563_s28  ;;  %2080 = vrot.lane.b32.xlu0 %v2043_v56, %s2562_s24 }
 0x17a   : > { %2145 = vrot.lane.b32.xlu1 %v2043_v56, %s2564_s29 }
 0x181   : > { %2141 = vrot.lane.b32.xlu2 %v2037_v49, %s2564_s29  ;;  %2109 = vrot.lane.b32.xlu0 %v2037_v49, %s2563_s28 }
 0x182   : > { %2174 = vrot.lane.b32.xlu1 %v2037_v49, %s2565_s30 }
 0x189   : > { %2210 = vrot.lane.b32.xlu2 %v2043_v56, %s2566_s8  ;;  %2178 = vrot.lane.b32.xlu0 %v2043_v56, %s2565_s30 }
 0x18a   : > { %2088 = vrot.lane.b32.xlu1 %v2055_v17, %s2562_s24 }
 0x191   : > { %2084 = vrot.lane.b32.xlu2 %v2049_v19, %s2562_s24  ;;  %2206 = vrot.lane.b32.xlu0 %v2037_v49, %s2566_s8 }
 0x192   : > { %2117 = vrot.lane.b32.xlu1 %v2049_v19, %s2563_s28 }
 0x199   : > { %2153 = vrot.lane.b32.xlu2 %v2055_v17, %s2564_s29  ;;  %2121 = vrot.lane.b32.xlu0 %v2055_v17, %s2563_s28 }
 0x19a   : > { %2186 = vrot.lane.b32.xlu1 %v2055_v17, %s2565_s30 }
 0x19b   : > { %v2051_v35 = vpop.f32.mrf.mxu2 }
 0x19c   : > { %v2052_v41 = vadd.f32 %v2510_v21, %v2051_v35 }
 0x19d   : > { %v2057_v1 = vpop.f32.mrf.mxu3 }
 0x19e   : > { %v2058_v8 = vadd.f32 %v2510_v21, %v2057_v1  ;;  %2065 = vst.msk [vmem:[%s3775_s23 + $0x28] sm:$0xff] %vm1966_vm3, %v2052_v41 }
 0x1a0   : > { %2067 = vst.msk [vmem:[%s3775_s23 + $0x38] sm:$0xff] %vm1966_vm3, %v2058_v8 }
 0x1a1   : > { %2182 = vrot.lane.b32.xlu2 %v2049_v19, %s2565_s30  ;;  %2149 = vrot.lane.b32.xlu0 %v2049_v19, %s2564_s29 }
 0x1a2   : > { %v2039_v42 = vpop.f32.mrf.mxu0  ;;  %2214 = vrot.lane.b32.xlu1 %v2049_v19, %s2566_s8 }
 0x1a3   : > { %v2040_v13 = vadd.f32 %v2510_v21, %v2039_v42 }
 0x1a4   : > { %v2045_v5 = vpop.f32.mrf.mxu1 }
 0x1a5   : > { %2061 = vst.msk [vmem:[%s3775_s23 + $0x8] sm:$0xff] %vm1966_vm3, %v2040_v13  ;;  %v2046_v53 = vadd.f32 %v2510_v21, %v2045_v5 }
 0x1a7   : > { %2063 = vst.msk [vmem:[%s3775_s23 + $0x18] sm:$0xff] %vm1966_vm3, %v2046_v53 }
 0x1a9   : > { %2078 = vrot.lane.b32.xlu2 %v2040_v13, %s2562_s24  ;;  %2115 = vrot.lane.b32.xlu0 %v2046_v53, %s2563_s28 }
 0x1aa   : > { %2082 = vrot.lane.b32.xlu1 %v2046_v53, %s2562_s24 }
 0x1b1   : > { %2147 = vrot.lane.b32.xlu2 %v2046_v53, %s2564_s29  ;;  %2143 = vrot.lane.b32.xlu0 %v2040_v13, %s2564_s29 }
 0x1b2   : > { %2111 = vrot.lane.b32.xlu1 %v2040_v13, %s2563_s28 }
 0x1b9   : > { %2176 = vrot.lane.b32.xlu2 %v2040_v13, %s2565_s30  ;;  %2212 = vrot.lane.b32.xlu0 %v2046_v53, %s2566_s8 }
 0x1ba   : > { %2180 = vrot.lane.b32.xlu1 %v2046_v53, %s2565_s30 }
 0x1c1   : > { %2090 = vrot.lane.b32.xlu2 %v2058_v8, %s2562_s24  ;;  %2086 = vrot.lane.b32.xlu0 %v2052_v41, %s2562_s24 }
 0x1c2   : > { %2208 = vrot.lane.b32.xlu1 %v2040_v13, %s2566_s8 }
 0x1c9   : > { %2119 = vrot.lane.b32.xlu2 %v2052_v41, %s2563_s28  ;;  %2155 = vrot.lane.b32.xlu0 %v2058_v8, %s2564_s29 }
 0x1ca   : > { %2123 = vrot.lane.b32.xlu1 %v2058_v8, %s2563_s28 }
 0x1d1   : > { %2188 = vrot.lane.b32.xlu2 %v2058_v8, %s2565_s30  ;;  %2184 = vrot.lane.b32.xlu0 %v2052_v41, %s2565_s30 }
 0x1d2   : > { %2151 = vrot.lane.b32.xlu1 %v2052_v41, %s2564_s29 }
 0x1d3   : > { %v2114_v37 = vpop.permute.xlu2 %2113 }
 0x1d4   : > { %2135 = vst.msk [vmem:[%s3833_s11 + $0x10] sm:$0xff] %vm1966_vm3, %v2114_v37 }
 0x1d9   : > { %2216 = vrot.lane.b32.xlu2 %v2052_v41, %s2566_s8  ;;  %2218 = vrot.lane.b32.xlu0 %v2055_v17, %s2566_s8 }
 0x1da   : > { %2220 = vrot.lane.b32.xlu1 %v2058_v8, %s2566_s8 }
 0x1db   : > { %v2142_v38 = vpop.permute.xlu2 %2141 }
 0x1dc   : > { %2451 = vst.msk [vmem:[%s3833_s11 + $0x40] sm:$0xff] %vm1966_vm3, %v2142_v38 }
 0x1e0   : > { %v2077_v30 = vpop.permute.xlu1 %2076 }
 0x1e1   : > { %2443 = vst.msk [vmem:[%s3775_s23 + $0x40] sm:$0xff] %vm1966_vm3, %v2077_v30 }
 0x1e3   : > { %v2211_v25 = vpop.permute.xlu2 %2210 }
 0x1e4   : > { %2461 = vst.msk [vmem:[%s3849_s14 + $0x50] sm:$0xff] %vm1966_vm3, %v2211_v25 }
 0x1eb   : > { %v2081_v27 = vpop.permute.xlu0 %2080  ;;  %v2085_v3 = vpop.permute.xlu2 %2084 }
 0x1ec   : > { %2445 = vst.msk [vmem:[%s3775_s23 + $0x50] sm:$0xff] %vm1966_vm3, %v2081_v27  ;;  %v2146_v63 = vpop.permute.xlu1 %2145 }
 0x1ed   : > { %2447 = vst.msk [vmem:[%s3775_s23 + $0x60] sm:$0xff] %vm1966_vm3, %v2085_v3 }
 0x1ee   : > { %2453 = vst.msk [vmem:[%s3833_s11 + $0x50] sm:$0xff] %vm1966_vm3, %v2146_v63 }
 0x1f3   : > { %v2154_v26 = vpop.permute.xlu2 %2153  ;;  %v2110_v57 = vpop.permute.xlu0 %2109 }
 0x1f4   : > { %2457 = vst.msk [vmem:[%s3833_s11 + $0x70] sm:$0xff] %vm1966_vm3, %v2154_v26  ;;  %v2175_v10 = vpop.permute.xlu1 %2174 }
 0x1f5   : > { %2133 = vst.msk [vmem:[%s3833_s11] sm:$0xff] %vm1966_vm3, %v2110_v57 }
 0x1f6   : > { %2198 = vst.msk [vmem:[%s3849_s14] sm:$0xff] %vm1966_vm3, %v2175_v10 }
 0x1fb   : > { %v2183_v58 = vpop.permute.xlu2 %2182  ;;  %v2179_v43 = vpop.permute.xlu0 %2178 }
 0x1fc   : > { %2202 = vst.msk [vmem:[%s3849_s14 + $0x20] sm:$0xff] %vm1966_vm3, %v2183_v58  ;;  %v2089_v36 = vpop.permute.xlu1 %2088 }
 0x1fd   : > { %2200 = vst.msk [vmem:[%s3849_s14 + $0x10] sm:$0xff] %vm1966_vm3, %v2179_v43 }
 0x1fe   : > { %2449 = vst.msk [vmem:[%s3775_s23 + $0x70] sm:$0xff] %vm1966_vm3, %v2089_v36 }
 0x203   : > { %v2079_v59 = vpop.permute.xlu2 %2078  ;;  %v2207_v24 = vpop.permute.xlu0 %2206 }
 0x204   : > { %2444 = vst.msk [vmem:[%s3775_s23 + $0x48] sm:$0xff] %vm1966_vm3, %v2079_v59  ;;  %v2118_v0 = vpop.permute.xlu1 %2117 }
 0x205   : > { %2459 = vst.msk [vmem:[%s3849_s14 + $0x40] sm:$0xff] %vm1966_vm3, %v2207_v24 }
 0x206   : > { %2137 = vst.msk [vmem:[%s3833_s11 + $0x20] sm:$0xff] %vm1966_vm3, %v2118_v0 }
 0x20b   : > { %v2148_v44 = vpop.permute.xlu2 %2147  ;;  %v2122_v60 = vpop.permute.xlu0 %2121 }
 0x20c   : > { %2454 = vst.msk [vmem:[%s3833_s11 + $0x58] sm:$0xff] %vm1966_vm3, %v2148_v44  ;;  %v2187_v6 = vpop.permute.xlu1 %2186 }
 0x20d   : > { %2139 = vst.msk [vmem:[%s3833_s11 + $0x30] sm:$0xff] %vm1966_vm3, %v2122_v60 }
 0x20e   : > { %2204 = vst.msk [vmem:[%s3849_s14 + $0x30] sm:$0xff] %vm1966_vm3, %v2187_v6 }
 0x213   : > { %v2177_v47 = vpop.permute.xlu2 %2176  ;;  %v2150_v45 = vpop.permute.xlu0 %2149 }
 0x214   : > { %2199 = vst.msk [vmem:[%s3849_s14 + $0x8] sm:$0xff] %vm1966_vm3, %v2177_v47  ;;  %v2215_v2 = vpop.permute.xlu1 %2214 }
 0x215   : > { %2455 = vst.msk [vmem:[%s3833_s11 + $0x60] sm:$0xff] %vm1966_vm3, %v2150_v45 }
 0x216   : > { %2463 = vst.msk [vmem:[%s3849_s14 + $0x60] sm:$0xff] %vm1966_vm3, %v2215_v2 }
 0x21b   : > { %v2091_v18 = vpop.permute.xlu2 %2090  ;;  %v2116_v34 = vpop.permute.xlu0 %2115 }
 0x21c   : > { %2450 = vst.msk [vmem:[%s3775_s23 + $0x78] sm:$0xff] %vm1966_vm3, %v2091_v18  ;;  %v2083_v15 = vpop.permute.xlu1 %2082 }
 0x21d   : > { %2136 = vst.msk [vmem:[%s3833_s11 + $0x18] sm:$0xff] %vm1966_vm3, %v2116_v34 }
 0x21e   : > { %2446 = vst.msk [vmem:[%s3775_s23 + $0x58] sm:$0xff] %vm1966_vm3, %v2083_v15 }
 0x223   : > { %v2120_v28 = vpop.permute.xlu2 %2119  ;;  %v2144_v51 = vpop.permute.xlu0 %2143 }
 0x224   : > { %2138 = vst.msk [vmem:[%s3833_s11 + $0x28] sm:$0xff] %vm1966_vm3, %v2120_v28  ;;  %v2112_v55 = vpop.permute.xlu1 %2111 }
 0x225   : > { %2452 = vst.msk [vmem:[%s3833_s11 + $0x48] sm:$0xff] %vm1966_vm3, %v2144_v51 }
 0x226   : > { %2134 = vst.msk [vmem:[%s3833_s11 + $0x8] sm:$0xff] %vm1966_vm3, %v2112_v55 }
 0x22b   : > { %v2189_v12 = vpop.permute.xlu2 %2188  ;;  %v2213_v54 = vpop.permute.xlu0 %2212 }
 0x22c   : > { %2205 = vst.msk [vmem:[%s3849_s14 + $0x38] sm:$0xff] %vm1966_vm3, %v2189_v12  ;;  %v2181_v9 = vpop.permute.xlu1 %2180 }
 0x22d   : > { %2462 = vst.msk [vmem:[%s3849_s14 + $0x58] sm:$0xff] %vm1966_vm3, %v2213_v54 }
 0x22e   : > { %2201 = vst.msk [vmem:[%s3849_s14 + $0x18] sm:$0xff] %vm1966_vm3, %v2181_v9 }
 0x233   : > { %v2217_v14 = vpop.permute.xlu2 %2216  ;;  %v2087_v62 = vpop.permute.xlu0 %2086 }
 0x234   : > { %2464 = vst.msk [vmem:[%s3849_s14 + $0x68] sm:$0xff] %vm1966_vm3, %v2217_v14  ;;  %v2209_v7 = vpop.permute.xlu1 %2208 }
 0x235   : > { %2448 = vst.msk [vmem:[%s3775_s23 + $0x68] sm:$0xff] %vm1966_vm3, %v2087_v62 }
 0x236   : > { %2460 = vst.msk [vmem:[%s3849_s14 + $0x48] sm:$0xff] %vm1966_vm3, %v2209_v7 }
 0x23b   : > { %v2156_v40 = vpop.permute.xlu0 %2155 }
 0x23c   : > { %2458 = vst.msk [vmem:[%s3833_s11 + $0x78] sm:$0xff] %vm1966_vm3, %v2156_v40  ;;  %v2124_v4 = vpop.permute.xlu1 %2123 }
 0x23d   : > { %2140 = vst.msk [vmem:[%s3833_s11 + $0x38] sm:$0xff] %vm1966_vm3, %v2124_v4 }
 0x243   : > { %v2185_v61 = vpop.permute.xlu0 %2184 }
 0x244   : > { %2203 = vst.msk [vmem:[%s3849_s14 + $0x28] sm:$0xff] %vm1966_vm3, %v2185_v61  ;;  %v2152_v52 = vpop.permute.xlu1 %2151 }
 0x245   : > { %2456 = vst.msk [vmem:[%s3833_s11 + $0x68] sm:$0xff] %vm1966_vm3, %v2152_v52 }
 0x24b   : > { %v2219_v11 = vpop.permute.xlu0 %2218 }
 0x24c   : > { %2465 = vst.msk [vmem:[%s3849_s14 + $0x70] sm:$0xff] %vm1966_vm3, %v2219_v11  ;;  %v2221_v16 = vpop.permute.xlu1 %2220 }
 0x24d   : > { %2466 = vst.msk [vmem:[%s3849_s14 + $0x78] sm:$0xff] %vm1966_vm3, %v2221_v16 }
 0x24e PF: > { %s18_s26 = sadd.s32 1, %s2558_s26   ;;  %s3942_s24 = smov %s2554_s25 }
 0x24f   : > { %p15_p5 = scmp.ge.s32.totalorder %s18_s26, 4   ;;  %s3943_s25 = smov %s3945_s27 }
 0x251   :  { %17 = sbr.rel (!%p15_p5) target bundleno = 2 (0x2), region = 98 }

</bundles_post_ra>
